<compile_context>
chip_gen: v7x
topology: tpu7x:2x2x1
jax: 0.10.0
libtpu: 0.0.40
codegen_flags: <defaults>
</compile_context>

<pallas_src>
import math

import jax
import jax.numpy as jnp
from jax.experimental import pallas as pl
from jax.experimental.pallas import tpu as pltpu  # noqa: F401  (TPU backend assumed)

# ----------------------------- problem sizes (small) -----------------------------
IMG_SIZE = 16                                   # opts.size
LATENT_DIM = 32                                 # opts.latent_dim
N_STYLES = int(math.log(IMG_SIZE, 2) * 2 - 2)   # = 6
BATCH = 2
N_FRAMES = 4
AUDIO_DIM = 64
HIDDEN = 256
AUDIO_HID = 128

F = N_STYLES * LATENT_DIM                       # 192  (flattened style latent)
FPAD = 256                                      # lane-dense padding of F
APAD = 128                                      # lane-dense padding of AUDIO_DIM / LATENT_DIM
MPAD = FPAD + APAD                              # 384  MotionEncoder input lanes [z_d | z_a]
IMG_FEAT = 3 * IMG_SIZE * IMG_SIZE              # 768  (already a multiple of 128)
RB = 8                                          # sublane-aligned row block; BATCH*N_FRAMES == RB

assert BATCH * N_FRAMES == RB and BATCH <= RB


# ============================ the fused Pallas kernel ============================

def _generator_kernel(vis_ref, xa_ref,
                      ve_w1, ve_b1, ve_w2, ve_b2,
                      ce_w1, ce_b1, ce_w2, ce_b2,
                      ae_w1, ae_b1, ae_w2, ae_b2,
                      me_w1, me_b1, me_w2, me_b2,
                      tf_w, tf_b, dec_w, dec_b,
                      im_ref, zscs_ref, zcds_ref, zfs_ref):
    f32, bf16 = jnp.float32, jnp.bfloat16

    def mlp(x_bf16, w1, b1, w2, b2):
        # fused two-layer MLP: relu(x@w1+b1)@w2+b2, bf16 MXU operands, f32 accumulate
        h = jnp.maximum(
            jnp.dot(x_bf16, w1[...], preferred_element_type=f32) + b1[...], 0.0)
        return jnp.dot(h.astype(bf16), w2[...], preferred_element_type=f32) + b2[...]

    # ---- VisualEncoder: one MXU pass over source rows [0:RB] + driving rows [RB:2RB] ----
    vis_out = mlp(vis_ref[...], ve_w1, ve_b1, ve_w2, ve_b2)        # (2*RB, FPAD)
    zs_src = vis_out[:RB]                                          # rows [:BATCH] real
    zs_drv = vis_out[RB:]                                          # all BATCH*N_FRAMES rows real

    # ---- CanonicalEncoder on the source latents ----
    zsc = mlp(zs_src.astype(bf16), ce_w1, ce_b1, ce_w2, ce_b2)     # (RB, FPAD)
    zscs_ref[...] = zsc[:BATCH]

    # ---- AudioEncoder ----
    za = mlp(xa_ref[...], ae_w1, ae_b1, ae_w2, ae_b2)              # (RB, APAD); lanes[32:] == 0

    # repeat each batch's audio latent over its N_FRAMES driving rows (sublane broadcast)
    za_rep = jnp.concatenate(
        [jnp.broadcast_to(za[b:b + 1], (N_FRAMES, APAD)) for b in range(BATCH)],
        axis=0)                                                    # (RB, APAD)

    # ---- MotionEncoder: input assembled in VMEM as [z_d (FPAD lanes) | z_a (APAD lanes)] ----
    me_in = jnp.concatenate([zs_drv, za_rep], axis=1)              # (RB, MPAD), lane-aligned concat
    zcd = mlp(me_in.astype(bf16), me_w1, me_b1, me_w2, me_b2)      # (RB, FPAD)
    zcds_ref[...] = zcd

    # ---- TemporalFusion: z_f[b] = (z_s_c[b] + mean_f z_c_d[b,f]) @ W_tf + b_tf (f32 mean) ----
    zm = jnp.concatenate(
        [zsc[b:b + 1] +
         jnp.mean(zcd[b * N_FRAMES:(b + 1) * N_FRAMES], axis=0, keepdims=True)
         for b in range(BATCH)], axis=0)                           # (BATCH, FPAD)
    zf = jnp.dot(zm.astype(bf16), tf_w[...], preferred_element_type=f32) + tf_b[...]
    zfs_ref[...] = zf

    # ---- Decoder: fused latent -> image, chained in the same kernel ----
    im_ref[...] = jnp.tanh(
        jnp.dot(zf.astype(bf16), dec_w[...], preferred_element_type=f32) + dec_b[...])


# ============================ Generator forward (wrapper) ============================

@jax.jit
def generator_forward(params, xss, xds, xas):
    bs = xss.shape[0]
    nf = xds.shape[1]
    assert bs == BATCH and nf == N_FRAMES and bs * nf == RB

    # bf16 image features at the kernel boundary; sublane-aligned row layout:
    #   rows [0:bs]            -> source frames
    #   rows [RB:RB + bs*nf]   -> driving frames (batch-major, frame-minor)
    vis_in = jnp.zeros((2 * RB, IMG_FEAT), jnp.bfloat16)
    vis_in = vis_in.at[:bs].set(xss.reshape(bs, IMG_FEAT).astype(jnp.bfloat16))
    vis_in = vis_in.at[RB:RB + bs * nf].set(
        xds.reshape(bs * nf, IMG_FEAT).astype(jnp.bfloat16))

    xa_in = jnp.zeros((RB, APAD), jnp.bfloat16)
    xa_in = xa_in.at[:bs, :AUDIO_DIM].set(xas.astype(jnp.bfloat16))

    out_shape = (
        jax.ShapeDtypeStruct((bs, IMG_FEAT), jnp.float32),     # decoded image (flat)
        jax.ShapeDtypeStruct((bs, FPAD), jnp.float32),         # z_s_c (lane-padded)
        jax.ShapeDtypeStruct((bs * nf, FPAD), jnp.float32),    # z_c_d (lane-padded)
        jax.ShapeDtypeStruct((bs, FPAD), jnp.float32),         # z_f   (lane-padded)
    )

    p = params
    # Single fused pallas_call: no grid, whole-array VMEM blocks (weights ~1.6 MiB bf16,
    # activations < 64 KiB -> far under scoped VMEM on v5e/v6e/v7x).
    im_flat, zscs_pad, zcds_pad, zfs_pad = pl.pallas_call(
        _generator_kernel,
        out_shape=out_shape,
    )(vis_in, xa_in,
      p["ve"]["w1"], p["ve"]["b1"], p["ve"]["w2"], p["ve"]["b2"],
      p["ce"]["w1"], p["ce"]["b1"], p["ce"]["w2"], p["ce"]["b2"],
      p["ae"]["w1"], p["ae"]["b1"], p["ae"]["w2"], p["ae"]["b2"],
      p["me"]["w1"], p["me"]["b1"], p["me"]["w2"], p["me"]["b2"],
      p["tf"]["w"], p["tf"]["b"],
      p["dec"]["w"], p["dec"]["b"])

    im = im_flat.reshape(bs, 3, IMG_SIZE, IMG_SIZE)
    zscs = zscs_pad[:, :F].reshape(bs, N_STYLES, LATENT_DIM)
    zcds = zcds_pad[:, :F].reshape(bs, nf, N_STYLES, LATENT_DIM)
    latents = zfs_pad[:, :F].reshape(bs, N_STYLES, LATENT_DIM)
    return im, zscs, zcds, latents


# ============================ parameter init ============================

def _init_linear(key, fan_in, fan_out):
    kw, kb = jax.random.split(key)
    w = jax.random.normal(kw, (fan_in, fan_out), jnp.float32) / jnp.sqrt(fan_in)
    b = 0.01 * jax.random.normal(kb, (fan_out,), jnp.float32)
    return w, b


def _pad2(w, rows, cols):
    r, c = w.shape
    return jnp.pad(w, ((0, rows - r), (0, cols - c)))


def _pad1(b, n):
    return jnp.pad(b, (0, n - b.shape[0]))


def init_params(key):
    ks = jax.random.split(key, 10)
    bf = lambda x: x.astype(jnp.bfloat16)
    p = {}

    # VisualEncoder: 768 -> 256 -> 192 (output lane-padded to FPAD; padded lanes exactly 0)
    w1, b1 = _init_linear(ks[0], IMG_FEAT, HIDDEN)
    w2, b2 = _init_linear(ks[1], HIDDEN, F)
    p["ve"] = dict(w1=bf(w1), b1=b1.reshape(1, HIDDEN),
                   w2=bf(_pad2(w2, HIDDEN, FPAD)), b2=_pad1(b2, FPAD).reshape(1, FPAD))

    # CanonicalEncoder: 192 -> 256 -> 192 (in/out lane-padded to FPAD)
    w1, b1 = _init_linear(ks[2], F, HIDDEN)
    w2, b2 = _init_linear(ks[3], HIDDEN, F)
    p["ce"] = dict(w1=bf(_pad2(w1, FPAD, HIDDEN)), b1=b1.reshape(1, HIDDEN),
                   w2=bf(_pad2(w2, HIDDEN, FPAD)), b2=_pad1(b2, FPAD).reshape(1, FPAD))

    # AudioEncoder: 64 -> 128 -> 32 (in/out lane-padded to APAD = 128 only)
    w1, b1 = _init_linear(ks[4], AUDIO_DIM, AUDIO_HID)
    w2, b2 = _init_linear(ks[5], AUDIO_HID, LATENT_DIM)
    p["ae"] = dict(w1=bf(_pad2(w1, APAD, AUDIO_HID)), b1=b1.reshape(1, AUDIO_HID),
                   w2=bf(_pad2(w2, AUDIO_HID, APAD)), b2=_pad1(b2, APAD).reshape(1, APAD))

    # MotionEncoder: (192 + 32) -> 256 -> 192, input laid out as [z_d pad 256 | z_a pad 128]
    w1, b1 = _init_linear(ks[6], F + LATENT_DIM, HIDDEN)
    w2, b2 = _init_linear(ks[7], HIDDEN, F)
    w1_l = jnp.zeros((MPAD, HIDDEN), jnp.float32)
    w1_l = w1_l.at[:F].set(w1[:F])                              # z_d rows
    w1_l = w1_l.at[FPAD:FPAD + LATENT_DIM].set(w1[F:])          # z_a rows
    p["me"] = dict(w1=bf(w1_l), b1=b1.reshape(1, HIDDEN),
                   w2=bf(_pad2(w2, HIDDEN, FPAD)), b2=_pad1(b2, FPAD).reshape(1, FPAD))

    # TemporalFusion: per-style (32,32) projection as a block-diagonal (192,192), lane-padded
    w, b = _init_linear(ks[8], LATENT_DIM, LATENT_DIM)
    w_bd = jnp.kron(jnp.eye(N_STYLES, dtype=jnp.float32), w)
    p["tf"] = dict(w=bf(_pad2(w_bd, FPAD, FPAD)),
                   b=_pad1(jnp.tile(b, N_STYLES), FPAD).reshape(1, FPAD))

    # Decoder: 192 -> 3*H*W image (tanh); input lane-padded to FPAD, output 768 lane-dense
    w, b = _init_linear(ks[9], F, IMG_FEAT)
    p["dec"] = dict(w=bf(_pad2(w, FPAD, IMG_FEAT)), b=b.reshape(1, IMG_FEAT))
    return p


# ============================ driver ============================

if __name__ == "__main__":
    key = jax.random.PRNGKey(0)
    k_param, k_xss, k_xds, k_xas = jax.random.split(key, 4)

    params = init_params(k_param)

    xss = jax.random.normal(k_xss, (BATCH, 3, IMG_SIZE, IMG_SIZE), jnp.float32)
    xds = jax.random.normal(k_xds, (BATCH, N_FRAMES, 3, IMG_SIZE, IMG_SIZE), jnp.float32)
    xas = jax.random.normal(k_xas, (BATCH, AUDIO_DIM), jnp.float32)

    im, zscs, zcds, latents = generator_forward(params, xss, xds, xas)
    jax.block_until_ready((im, zscs, zcds, latents))

    assert im.shape == (BATCH, 3, IMG_SIZE, IMG_SIZE)
    assert zscs.shape == (BATCH, N_STYLES, LATENT_DIM)
    assert zcds.shape == (BATCH, N_FRAMES, N_STYLES, LATENT_DIM)
    assert latents.shape == (BATCH, N_STYLES, LATENT_DIM)
    assert bool(jnp.all(jnp.isfinite(im)))

    print("KERNEL_OK")
</pallas_src>

<mosaic_0001>
module attributes {stable_mosaic.version = 11 : i64} {
  func.func @_generator_kernel(%arg0: memref<16x768xbf16, #tpu.memory_space<vmem>>, %arg1: memref<8x128xbf16, #tpu.memory_space<vmem>>, %arg2: memref<768x256xbf16, #tpu.memory_space<vmem>>, %arg3: memref<1x256xf32, #tpu.memory_space<vmem>>, %arg4: memref<256x256xbf16, #tpu.memory_space<vmem>>, %arg5: memref<1x256xf32, #tpu.memory_space<vmem>>, %arg6: memref<256x256xbf16, #tpu.memory_space<vmem>>, %arg7: memref<1x256xf32, #tpu.memory_space<vmem>>, %arg8: memref<256x256xbf16, #tpu.memory_space<vmem>>, %arg9: memref<1x256xf32, #tpu.memory_space<vmem>>, %arg10: memref<128x128xbf16, #tpu.memory_space<vmem>>, %arg11: memref<1x128xf32, #tpu.memory_space<vmem>>, %arg12: memref<128x128xbf16, #tpu.memory_space<vmem>>, %arg13: memref<1x128xf32, #tpu.memory_space<vmem>>, %arg14: memref<384x256xbf16, #tpu.memory_space<vmem>>, %arg15: memref<1x256xf32, #tpu.memory_space<vmem>>, %arg16: memref<256x256xbf16, #tpu.memory_space<vmem>>, %arg17: memref<1x256xf32, #tpu.memory_space<vmem>>, %arg18: memref<256x256xbf16, #tpu.memory_space<vmem>>, %arg19: memref<1x256xf32, #tpu.memory_space<vmem>>, %arg20: memref<256x768xbf16, #tpu.memory_space<vmem>>, %arg21: memref<1x768xf32, #tpu.memory_space<vmem>>, %arg22: memref<2x768xf32, #tpu.memory_space<vmem>>, %arg23: memref<2x256xf32, #tpu.memory_space<vmem>>, %arg24: memref<8x256xf32, #tpu.memory_space<vmem>>, %arg25: memref<2x256xf32, #tpu.memory_space<vmem>>) attributes {dimension_semantics = [], scalar_prefetch = 0 : i64, scratch_operands = 0 : i64, tpu.core_type = #tpu.core_type<tc>} {
    %c0 = arith.constant 0 : index
    %c0_0 = arith.constant 0 : index
    %0 = vector.load %arg0[%c0, %c0_0] : memref<16x768xbf16, #tpu.memory_space<vmem>>, vector<16x768xbf16>
    %c0_1 = arith.constant 0 : index
    %c0_2 = arith.constant 0 : index
    %1 = vector.load %arg2[%c0_1, %c0_2] : memref<768x256xbf16, #tpu.memory_space<vmem>>, vector<768x256xbf16>
    %cst = arith.constant dense<0.000000e+00> : vector<16x256xf32>
    %2 = tpu.matmul %0, %1, %cst {dimension_numbers = #tpu.dot_dimension_numbers<[1], [0], [0], [1], [0, 0, 1, 1], [], []>} : vector<16x768xbf16>, vector<768x256xbf16>, vector<16x256xf32> -> vector<16x256xf32>
    %c0_3 = arith.constant 0 : index
    %c0_4 = arith.constant 0 : index
    %3 = vector.load %arg3[%c0_3, %c0_4] : memref<1x256xf32, #tpu.memory_space<vmem>>, vector<1x256xf32>
    %4 = vector.broadcast %3 : vector<1x256xf32> to vector<16x256xf32>
    %5 = arith.addf %2, %4 : vector<16x256xf32>
    %cst_5 = arith.constant 0.000000e+00 : f32
    %6 = vector.broadcast %cst_5 : f32 to vector<16x256xf32>
    %7 = arith.maximumf %5, %6 : vector<16x256xf32>
    %8 = arith.truncf %7 : vector<16x256xf32> to vector<16x256xbf16>
    %c0_6 = arith.constant 0 : index
    %c0_7 = arith.constant 0 : index
    %9 = vector.load %arg4[%c0_6, %c0_7] : memref<256x256xbf16, #tpu.memory_space<vmem>>, vector<256x256xbf16>
    %cst_8 = arith.constant dense<0.000000e+00> : vector<16x256xf32>
    %10 = tpu.matmul %8, %9, %cst_8 {dimension_numbers = #tpu.dot_dimension_numbers<[1], [0], [0], [1], [0, 0, 1, 1], [], []>} : vector<16x256xbf16>, vector<256x256xbf16>, vector<16x256xf32> -> vector<16x256xf32>
    %c0_9 = arith.constant 0 : index
    %c0_10 = arith.constant 0 : index
    %11 = vector.load %arg5[%c0_9, %c0_10] : memref<1x256xf32, #tpu.memory_space<vmem>>, vector<1x256xf32>
    %12 = vector.broadcast %11 : vector<1x256xf32> to vector<16x256xf32>
    %13 = arith.addf %10, %12 : vector<16x256xf32>
    %14 = vector.extract_strided_slice %13 {offsets = [0, 0], sizes = [8, 256], strides = [1, 1]} : vector<16x256xf32> to vector<8x256xf32>
    %15 = vector.extract_strided_slice %13 {offsets = [8, 0], sizes = [8, 256], strides = [1, 1]} : vector<16x256xf32> to vector<8x256xf32>
    %16 = arith.truncf %14 : vector<8x256xf32> to vector<8x256xbf16>
    %c0_11 = arith.constant 0 : index
    %c0_12 = arith.constant 0 : index
    %17 = vector.load %arg6[%c0_11, %c0_12] : memref<256x256xbf16, #tpu.memory_space<vmem>>, vector<256x256xbf16>
    %cst_13 = arith.constant dense<0.000000e+00> : vector<8x256xf32>
    %18 = tpu.matmul %16, %17, %cst_13 {dimension_numbers = #tpu.dot_dimension_numbers<[1], [0], [0], [1], [0, 0, 1, 1], [], []>} : vector<8x256xbf16>, vector<256x256xbf16>, vector<8x256xf32> -> vector<8x256xf32>
    %c0_14 = arith.constant 0 : index
    %c0_15 = arith.constant 0 : index
    %19 = vector.load %arg7[%c0_14, %c0_15] : memref<1x256xf32, #tpu.memory_space<vmem>>, vector<1x256xf32>
    %20 = vector.broadcast %19 : vector<1x256xf32> to vector<8x256xf32>
    %21 = arith.addf %18, %20 : vector<8x256xf32>
    %cst_16 = arith.constant 0.000000e+00 : f32
    %22 = vector.broadcast %cst_16 : f32 to vector<8x256xf32>
    %23 = arith.maximumf %21, %22 : vector<8x256xf32>
    %24 = arith.truncf %23 : vector<8x256xf32> to vector<8x256xbf16>
    %c0_17 = arith.constant 0 : index
    %c0_18 = arith.constant 0 : index
    %25 = vector.load %arg8[%c0_17, %c0_18] : memref<256x256xbf16, #tpu.memory_space<vmem>>, vector<256x256xbf16>
    %cst_19 = arith.constant dense<0.000000e+00> : vector<8x256xf32>
    %26 = tpu.matmul %24, %25, %cst_19 {dimension_numbers = #tpu.dot_dimension_numbers<[1], [0], [0], [1], [0, 0, 1, 1], [], []>} : vector<8x256xbf16>, vector<256x256xbf16>, vector<8x256xf32> -> vector<8x256xf32>
    %c0_20 = arith.constant 0 : index
    %c0_21 = arith.constant 0 : index
    %27 = vector.load %arg9[%c0_20, %c0_21] : memref<1x256xf32, #tpu.memory_space<vmem>>, vector<1x256xf32>
    %28 = vector.broadcast %27 : vector<1x256xf32> to vector<8x256xf32>
    %29 = arith.addf %26, %28 : vector<8x256xf32>
    %30 = vector.extract_strided_slice %29 {offsets = [0, 0], sizes = [2, 256], strides = [1, 1]} : vector<8x256xf32> to vector<2x256xf32>
    %c0_22 = arith.constant 0 : index
    %c0_23 = arith.constant 0 : index
    %31 = vector.load %arg23[%c0_22, %c0_23] : memref<2x256xf32, #tpu.memory_space<vmem>>, vector<2x256xf32>
    tpu.vector_store %arg23[%c0_22, %c0_23], %30 {strides = array<i32>} : memref<2x256xf32, #tpu.memory_space<vmem>>, vector<2x256xf32>,
    %c0_24 = arith.constant 0 : index
    %c0_25 = arith.constant 0 : index
    %32 = vector.load %arg1[%c0_24, %c0_25] : memref<8x128xbf16, #tpu.memory_space<vmem>>, vector<8x128xbf16>
    %c0_26 = arith.constant 0 : index
    %c0_27 = arith.constant 0 : index
    %33 = vector.load %arg10[%c0_26, %c0_27] : memref<128x128xbf16, #tpu.memory_space<vmem>>, vector<128x128xbf16>
    %cst_28 = arith.constant dense<0.000000e+00> : vector<8x128xf32>
    %34 = tpu.matmul %32, %33, %cst_28 {dimension_numbers = #tpu.dot_dimension_numbers<[1], [0], [0], [1], [0, 0, 1, 1], [], []>} : vector<8x128xbf16>, vector<128x128xbf16>, vector<8x128xf32> -> vector<8x128xf32>
    %c0_29 = arith.constant 0 : index
    %c0_30 = arith.constant 0 : index
    %35 = vector.load %arg11[%c0_29, %c0_30] : memref<1x128xf32, #tpu.memory_space<vmem>>, vector<1x128xf32>
    %36 = vector.broadcast %35 : vector<1x128xf32> to vector<8x128xf32>
    %37 = arith.addf %34, %36 : vector<8x128xf32>
    %cst_31 = arith.constant 0.000000e+00 : f32
    %38 = vector.broadcast %cst_31 : f32 to vector<8x128xf32>
    %39 = arith.maximumf %37, %38 : vector<8x128xf32>
    %40 = arith.truncf %39 : vector<8x128xf32> to vector<8x128xbf16>
    %c0_32 = arith.constant 0 : index
    %c0_33 = arith.constant 0 : index
    %41 = vector.load %arg12[%c0_32, %c0_33] : memref<128x128xbf16, #tpu.memory_space<vmem>>, vector<128x128xbf16>
    %cst_34 = arith.constant dense<0.000000e+00> : vector<8x128xf32>
    %42 = tpu.matmul %40, %41, %cst_34 {dimension_numbers = #tpu.dot_dimension_numbers<[1], [0], [0], [1], [0, 0, 1, 1], [], []>} : vector<8x128xbf16>, vector<128x128xbf16>, vector<8x128xf32> -> vector<8x128xf32>
    %c0_35 = arith.constant 0 : index
    %c0_36 = arith.constant 0 : index
    %43 = vector.load %arg13[%c0_35, %c0_36] : memref<1x128xf32, #tpu.memory_space<vmem>>, vector<1x128xf32>
    %44 = vector.broadcast %43 : vector<1x128xf32> to vector<8x128xf32>
    %45 = arith.addf %42, %44 : vector<8x128xf32>
    %46 = vector.extract_strided_slice %45 {offsets = [0, 0], sizes = [1, 128], strides = [1, 1]} : vector<8x128xf32> to vector<1x128xf32>
    %47 = vector.shape_cast %46 : vector<1x128xf32> to vector<1x128xf32>
    %48 = vector.broadcast %47 : vector<1x128xf32> to vector<4x128xf32>
    %49 = vector.extract_strided_slice %45 {offsets = [1, 0], sizes = [1, 128], strides = [1, 1]} : vector<8x128xf32> to vector<1x128xf32>
    %50 = vector.shape_cast %49 : vector<1x128xf32> to vector<1x128xf32>
    %51 = vector.broadcast %50 : vector<1x128xf32> to vector<4x128xf32>
    %52 = tpu.concatenate %48, %51 in 0 : vector<4x128xf32>, vector<4x128xf32> -> vector<8x128xf32>
    %53 = tpu.concatenate %15, %52 in 1 : vector<8x256xf32>, vector<8x128xf32> -> vector<8x384xf32>
    %54 = arith.truncf %53 : vector<8x384xf32> to vector<8x384xbf16>
    %c0_37 = arith.constant 0 : index
    %c0_38 = arith.constant 0 : index
    %55 = vector.load %arg14[%c0_37, %c0_38] : memref<384x256xbf16, #tpu.memory_space<vmem>>, vector<384x256xbf16>
    %cst_39 = arith.constant dense<0.000000e+00> : vector<8x256xf32>
    %56 = tpu.matmul %54, %55, %cst_39 {dimension_numbers = #tpu.dot_dimension_numbers<[1], [0], [0], [1], [0, 0, 1, 1], [], []>} : vector<8x384xbf16>, vector<384x256xbf16>, vector<8x256xf32> -> vector<8x256xf32>
    %c0_40 = arith.constant 0 : index
    %c0_41 = arith.constant 0 : index
    %57 = vector.load %arg15[%c0_40, %c0_41] : memref<1x256xf32, #tpu.memory_space<vmem>>, vector<1x256xf32>
    %58 = vector.broadcast %57 : vector<1x256xf32> to vector<8x256xf32>
    %59 = arith.addf %56, %58 : vector<8x256xf32>
    %cst_42 = arith.constant 0.000000e+00 : f32
    %60 = vector.broadcast %cst_42 : f32 to vector<8x256xf32>
    %61 = arith.maximumf %59, %60 : vector<8x256xf32>
    %62 = arith.truncf %61 : vector<8x256xf32> to vector<8x256xbf16>
    %c0_43 = arith.constant 0 : index
    %c0_44 = arith.constant 0 : index
    %63 = vector.load %arg16[%c0_43, %c0_44] : memref<256x256xbf16, #tpu.memory_space<vmem>>, vector<256x256xbf16>
    %cst_45 = arith.constant dense<0.000000e+00> : vector<8x256xf32>
    %64 = tpu.matmul %62, %63, %cst_45 {dimension_numbers = #tpu.dot_dimension_numbers<[1], [0], [0], [1], [0, 0, 1, 1], [], []>} : vector<8x256xbf16>, vector<256x256xbf16>, vector<8x256xf32> -> vector<8x256xf32>
    %c0_46 = arith.constant 0 : index
    %c0_47 = arith.constant 0 : index
    %65 = vector.load %arg17[%c0_46, %c0_47] : memref<1x256xf32, #tpu.memory_space<vmem>>, vector<1x256xf32>
    %66 = vector.broadcast %65 : vector<1x256xf32> to vector<8x256xf32>
    %67 = arith.addf %64, %66 : vector<8x256xf32>
    %c0_48 = arith.constant 0 : index
    %c0_49 = arith.constant 0 : index
    %68 = vector.load %arg24[%c0_48, %c0_49] : memref<8x256xf32, #tpu.memory_space<vmem>>, vector<8x256xf32>
    tpu.vector_store %arg24[%c0_48, %c0_49], %67 {strides = array<i32>} : memref<8x256xf32, #tpu.memory_space<vmem>>, vector<8x256xf32>,
    %69 = vector.extract_strided_slice %29 {offsets = [0, 0], sizes = [1, 256], strides = [1, 1]} : vector<8x256xf32> to vector<1x256xf32>
    %70 = vector.extract_strided_slice %67 {offsets = [0, 0], sizes = [4, 256], strides = [1, 1]} : vector<8x256xf32> to vector<4x256xf32>
    %cst_50 = arith.constant dense<0.000000e+00> : vector<256xf32>
    %71 = vector.multi_reduction <add>, %70, %cst_50 [0] : vector<4x256xf32> to vector<256xf32>
    %72 = vector.shape_cast %71 : vector<256xf32> to vector<1x256xf32>
    %cst_51 = arith.constant 4.000000e+00 : f32
    %73 = vector.broadcast %cst_51 : f32 to vector<1x256xf32>
    %74 = arith.divf %72, %73 : vector<1x256xf32>
    %75 = arith.addf %69, %74 : vector<1x256xf32>
    %76 = vector.extract_strided_slice %29 {offsets = [1, 0], sizes = [1, 256], strides = [1, 1]} : vector<8x256xf32> to vector<1x256xf32>
    %77 = vector.extract_strided_slice %67 {offsets = [4, 0], sizes = [4, 256], strides = [1, 1]} : vector<8x256xf32> to vector<4x256xf32>
    %cst_52 = arith.constant dense<0.000000e+00> : vector<256xf32>
    %78 = vector.multi_reduction <add>, %77, %cst_52 [0] : vector<4x256xf32> to vector<256xf32>
    %79 = vector.shape_cast %78 : vector<256xf32> to vector<1x256xf32>
    %cst_53 = arith.constant 4.000000e+00 : f32
    %80 = vector.broadcast %cst_53 : f32 to vector<1x256xf32>
    %81 = arith.divf %79, %80 : vector<1x256xf32>
    %82 = arith.addf %76, %81 : vector<1x256xf32>
    %83 = tpu.concatenate %75, %82 in 0 : vector<1x256xf32>, vector<1x256xf32> -> vector<2x256xf32>
    %84 = arith.truncf %83 : vector<2x256xf32> to vector<2x256xbf16>
    %c0_54 = arith.constant 0 : index
    %c0_55 = arith.constant 0 : index
    %85 = vector.load %arg18[%c0_54, %c0_55] : memref<256x256xbf16, #tpu.memory_space<vmem>>, vector<256x256xbf16>
    %cst_56 = arith.constant dense<0.000000e+00> : vector<2x256xf32>
    %86 = tpu.matmul %84, %85, %cst_56 {dimension_numbers = #tpu.dot_dimension_numbers<[1], [0], [0], [1], [0, 0, 1, 1], [], []>} : vector<2x256xbf16>, vector<256x256xbf16>, vector<2x256xf32> -> vector<2x256xf32>
    %c0_57 = arith.constant 0 : index
    %c0_58 = arith.constant 0 : index
    %87 = vector.load %arg19[%c0_57, %c0_58] : memref<1x256xf32, #tpu.memory_space<vmem>>, vector<1x256xf32>
    %88 = vector.broadcast %87 : vector<1x256xf32> to vector<2x256xf32>
    %89 = arith.addf %86, %88 : vector<2x256xf32>
    %c0_59 = arith.constant 0 : index
    %c0_60 = arith.constant 0 : index
    %90 = vector.load %arg25[%c0_59, %c0_60] : memref<2x256xf32, #tpu.memory_space<vmem>>, vector<2x256xf32>
    tpu.vector_store %arg25[%c0_59, %c0_60], %89 {strides = array<i32>} : memref<2x256xf32, #tpu.memory_space<vmem>>, vector<2x256xf32>,
    %91 = arith.truncf %89 : vector<2x256xf32> to vector<2x256xbf16>
    %c0_61 = arith.constant 0 : index
    %c0_62 = arith.constant 0 : index
    %92 = vector.load %arg20[%c0_61, %c0_62] : memref<256x768xbf16, #tpu.memory_space<vmem>>, vector<256x768xbf16>
    %cst_63 = arith.constant dense<0.000000e+00> : vector<2x768xf32>
    %93 = tpu.matmul %91, %92, %cst_63 {dimension_numbers = #tpu.dot_dimension_numbers<[1], [0], [0], [1], [0, 0, 1, 1], [], []>} : vector<2x256xbf16>, vector<256x768xbf16>, vector<2x768xf32> -> vector<2x768xf32>
    %c0_64 = arith.constant 0 : index
    %c0_65 = arith.constant 0 : index
    %94 = vector.load %arg21[%c0_64, %c0_65] : memref<1x768xf32, #tpu.memory_space<vmem>>, vector<1x768xf32>
    %95 = vector.broadcast %94 : vector<1x768xf32> to vector<2x768xf32>
    %96 = arith.addf %93, %95 : vector<2x768xf32>
    %97 = math.tanh %96 : vector<2x768xf32>
    %c0_66 = arith.constant 0 : index
    %c0_67 = arith.constant 0 : index
    %98 = vector.load %arg22[%c0_66, %c0_67] : memref<2x768xf32, #tpu.memory_space<vmem>>, vector<2x768xf32>
    tpu.vector_store %arg22[%c0_66, %c0_67], %97 {strides = array<i32>} : memref<2x768xf32, #tpu.memory_space<vmem>>, vector<2x768xf32>,
    return
  }
}

</mosaic_0001>

<bundles_post_ra>
// kernel: generator_forward.1
= control target key start
LH: loop header
LB: loop body
LE: loop exit
PB: predicated region body
PF: predicated region fallthrough
CT: control target
= control target key end

     0   :  { %s5939_s0 = inlined_call_operand.vmem [shape: bf16[16,768], index: 0, kind: input, shape index: {}]   ;;  %s5940_s1 = inlined_call_operand.vmem [shape: bf16[8,128], index: 1, kind: input, shape index: {}]   ;;  %s5941_s2 = inlined_call_operand.vmem [shape: bf16[768,256], index: 2, kind: input, shape index: {}]   ;;  %s5942_s3 = inlined_call_operand.vmem [shape: f32[1,256], index: 3, kind: input, shape index: {}]   ;;  %s5943_s4 = inlined_call_operand.vmem [shape: bf16[256,256], index: 4, kind: input, shape index: {}]   ;;  %s5944_s5 = inlined_call_operand.vmem [shape: f32[1,256], index: 5, kind: input, shape index: {}]   ;;  %s5945_s6 = inlined_call_operand.hbm [shape: bf16[256,256], index: 6, kind: input, shape index: {}]   ;;  %s5946_s7 = inlined_call_operand.vmem [shape: f32[1,256], index: 7, kind: input, shape index: {}]   ;;  %s5947_s8 = inlined_call_operand.hbm [shape: bf16[256,256], index: 8, kind: input, shape index: {}]   ;;  %s5948_s9 = inlined_call_operand.vmem [shape: f32[1,256], index: 9, kind: input, shape index: {}]   ;;  %s5949_s10 = inlined_call_operand.hbm [shape: bf16[128,128], index: 10, kind: input, shape index: {}]   ;;  %s5950_s11 = inlined_call_operand.vmem [shape: f32[1,128], index: 11, kind: input, shape index: {}]   ;;  %s5951_s12 = inlined_call_operand.hbm [shape: bf16[128,128], index: 12, kind: input, shape index: {}]   ;;  %s5952_s13 = inlined_call_operand.vmem [shape: f32[1,128], index: 13, kind: input, shape index: {}]   ;;  %s5953_s14 = inlined_call_operand.hbm [shape: bf16[384,256], index: 14, kind: input, shape index: {}]   ;;  %s5954_s15 = inlined_call_operand.hbm [shape: f32[1,256], index: 15, kind: input, shape index: {}]   ;;  %s5955_s16 = inlined_call_operand.hbm [shape: bf16[256,256], index: 16, kind: input, shape index: {}]   ;;  %s5956_s17 = inlined_call_operand.hbm [shape: f32[1,256], index: 17, kind: input, shape index: {}]   ;;  %s5957_s18 = inlined_call_operand.hbm [shape: bf16[256,256], index: 18, kind: input, shape index: {}]   ;;  %s5958_s19 = inlined_call_operand.hbm [shape: f32[1,256], index: 19, kind: input, shape index: {}]   ;;  %s5959_s20 = inlined_call_operand.hbm [shape: bf16[256,768], index: 20, kind: input, shape index: {}]   ;;  %s5960_s21 = inlined_call_operand.vmem [shape: f32[1,768], index: 21, kind: input, shape index: {}]   ;;  %s5961_s22 = inlined_call_operand.vmem [shape: f32[2,768], index: 22, kind: output, shape index: {0}]   ;;  %s5962_s23 = inlined_call_operand.vmem [shape: f32[2,256], index: 23, kind: output, shape index: {1}]   ;;  %s5963_s24 = inlined_call_operand.vmem [shape: f32[8,256], index: 24, kind: output, shape index: {2}]   ;;  %s5964_s25 = inlined_call_operand.vmem [shape: f32[2,256], index: 25, kind: output, shape index: {3}]  }
   0x1   :  { %5971 = sst [smem:[#allocation25_spill]] %s5939_s0 }
   0x2   :  { %5972 = sst [smem:[#allocation26_spill]] %s5940_s1 }
   0x3   :  { %5973 = sst [smem:[#allocation27_spill]] %s5941_s2 }
   0x4   :  { %5974 = sst [smem:[#allocation28_spill]] %s5942_s3 }
   0x5   :  { %5975 = sst [smem:[#allocation29_spill]] %s5943_s4 }
   0x6   :  { %5976 = sst [smem:[#allocation30_spill]] %s5944_s5 }
   0x7   :  { %5977 = sst [smem:[#allocation31_spill]] %s5945_s6 }
   0x8   :  { %5978 = sst [smem:[#allocation32_spill]] %s5946_s7 }
   0x9   :  { %5979 = sst [smem:[#allocation33_spill]] %s5947_s8 }
   0xa   :  { %5980 = sst [smem:[#allocation34_spill]] %s5948_s9 }
   0xb   :  { %5981 = sst [smem:[#allocation35_spill]] %s5960_s21 }
   0xc   :  { %5982 = sst [smem:[#allocation36_spill]] %s5961_s22 }
   0xd   :  { %31 = vsyncpa [#allocation3], 0 }
   0xe   :  { %32 = vsyncpa [#allocation5], 0 }
   0xf   :  { %33 = vsyncpa [#allocation8], 0 }
  0x10   :  { %34 = vsyncpa [#allocation11], 0 }
  0x11   :  { %35 = vsyncpa [#allocation14], 0 }
  0x12   :  { %36 = vsyncpa [#allocation17], 0  ;;  %s5120_s29 = smov [#allocation4]   ;;  %s5983_s7 = sld [smem:[#allocation33_spill]] }
  0x13   :  { %s68_s2 = sshll.u32 %s5120_s29, 4  ;;  %s69_s2 = int_to_ptr.vmem [resolvable:$true] %s68_s2 }
  0x18   :  { %s4866_s3 = scalar_lea.hbm %s5983_s7, 4096 }
  0x19   :  { %p4867_p0 = scmp.ne.s32.totalorder %s5983_s7, %s4866_s3  ;;  %p4870_p1 = scmp.lt.u32.totalorder %s4866_s3, %s5983_s7 }
  0x1b   :  { %p4872_p2 = pnand %p4870_p1, %p4867_p0 }
  0x1d   :  { %4875 = shalt.err (!%p4872_p2)
}
  0x1e   :  { %s4876_s4 = scalar_lea.vmem %s69_s2, 4096  ;;  %p4881_p4 = scmp.lt.s32.totalorder %s69_s2, %s69_s2 }
  0x1f   :  { %p4877_p3 = scmp.ne.s32.totalorder %s69_s2, %s4876_s4  ;;  %p4882_p5 = scmp.lt.s32.totalorder %s4876_s4, %s4876_s4 }
  0x21   :  { %p4883_p6 = por %p4882_p5, %p4881_p4 }
  0x23   :  { %p4884_p7 = pnand %p4883_p6, %p4877_p3 }
  0x25   :  { %4887 = shalt.err (!%p4884_p7)
}
  0x26   :  { %s5121_s28 = smov 128   ;;  %s5122_s9 = smov 8  }
  0x27   :  { %74 = dma.hbm_to_vmem [thread:$0]  %s5983_s7, 4096, %s69_s2, [#allocation5], %s5121_s28, %s5121_s28, %s5122_s9  }
  0x28   :  { %s5123_s29 = smov [#allocation7]   ;;  %s5124_s30 = smov [#allocation10]  }
  0x29   :  { %s96_s6 = sshll.u32 %s5123_s29, 4  ;;  %s123_s3 = sshll.u32 %s5124_s30, 4  ;;  %s97_s6 = int_to_ptr.vmem [resolvable:$true] %s96_s6  ;;  %s124_s3 = int_to_ptr.vmem [resolvable:$true] %s123_s3 }
  0x2a   :  { %s4888_s8 = scalar_lea.hbm %s5951_s12, 1024 }
  0x2b   :  { %p4889_p8 = scmp.ne.s32.totalorder %s5951_s12, %s4888_s8  ;;  %p4892_p9 = scmp.lt.u32.totalorder %s4888_s8, %s5951_s12 }
  0x2d   :  { %p4894_p10 = pnand %p4892_p9, %p4889_p8 }
  0x2f   :  { %4897 = shalt.err (!%p4894_p10)
}
  0x30   :  { %s4898_s2 = scalar_lea.vmem %s97_s6, 1024  ;;  %p4903_p12 = scmp.lt.s32.totalorder %s97_s6, %s97_s6 }
  0x31   :  { %p4899_p11 = scmp.ne.s32.totalorder %s97_s6, %s4898_s2  ;;  %p4904_p13 = scmp.lt.s32.totalorder %s4898_s2, %s4898_s2 }
  0x33   :  { %p4905_p0 = por %p4904_p13, %p4903_p12 }
  0x35   :  { %p4906_p1 = pnand %p4905_p0, %p4899_p11 }
  0x37   :  { %4909 = shalt.err (!%p4906_p1)
}
  0x38   :  { %s5125_s7 = smov 64   ;;  %s5126_s5 = smov 4  }
  0x39   :  { %102 = dma.hbm_to_vmem [thread:$0]  %s5951_s12, 1024, %s97_s6, [#allocation8], %s5125_s7, %s5125_s7, %s5126_s5  }
  0x3a   :  { %s4910_s30 = scalar_lea.hbm %s5954_s15, 32 }
  0x3b   :  { %p4911_p2 = scmp.ne.s32.totalorder %s5954_s15, %s4910_s30  ;;  %p4914_p3 = scmp.lt.u32.totalorder %s4910_s30, %s5954_s15 }
  0x3d   :  { %p4916_p4 = pnand %p4914_p3, %p4911_p2 }
  0x3f   :  { %4919 = shalt.err (!%p4916_p4)
}
  0x40   :  { %s4920_s4 = scalar_lea.vmem %s124_s3, 32  ;;  %p4925_p6 = scmp.lt.s32.totalorder %s124_s3, %s124_s3 }
  0x41   :  { %p4921_p5 = scmp.ne.s32.totalorder %s124_s3, %s4920_s4  ;;  %p4926_p7 = scmp.lt.s32.totalorder %s4920_s4, %s4920_s4 }
  0x43   :  { %p4927_p8 = por %p4926_p7, %p4925_p6 }
  0x45   :  { %p4928_p9 = pnand %p4927_p8, %p4921_p5 }
  0x47   :  { %4931 = shalt.err (!%p4928_p9)
}
  0x48   :  { %126 = dma.hbm_to_vmem [thread:$0]  %s5954_s15, 32, %s124_s3, [#allocation11]  }
  0x49   :  { %s5127_s2 = smov [#allocation13]   ;;  %s5128_s29 = smov [#allocation16]  }
  0x4a   :  { %s145_s0 = sshll.u32 %s5127_s2, 4  ;;  %s167_s21 = sshll.u32 %s5128_s29, 4  ;;  %s146_s0 = int_to_ptr.vmem [resolvable:$true] %s145_s0  ;;  %s168_s21 = int_to_ptr.vmem [resolvable:$true] %s167_s21 }
  0x4b   :  { %s4932_s26 = scalar_lea.hbm %s5956_s17, 32 }
  0x4c   :  { %p4933_p10 = scmp.ne.s32.totalorder %s5956_s17, %s4932_s26  ;;  %p4936_p11 = scmp.lt.u32.totalorder %s4932_s26, %s5956_s17 }
  0x4e   :  { %p4938_p12 = pnand %p4936_p11, %p4933_p10 }
  0x50   :  { %4941 = shalt.err (!%p4938_p12)
}
  0x51   :  { %s4942_s15 = scalar_lea.vmem %s146_s0, 32  ;;  %p4947_p0 = scmp.lt.s32.totalorder %s146_s0, %s146_s0 }
  0x52   :  { %p4943_p13 = scmp.ne.s32.totalorder %s146_s0, %s4942_s15  ;;  %p4948_p1 = scmp.lt.s32.totalorder %s4942_s15, %s4942_s15 }
  0x54   :  { %p4949_p2 = por %p4948_p1, %p4947_p0 }
  0x56   :  { %p4950_p3 = pnand %p4949_p2, %p4943_p13 }
  0x58   :  { %4953 = shalt.err (!%p4950_p3)
}
  0x59   :  { %148 = dma.hbm_to_vmem [thread:$0]  %s5956_s17, 32, %s146_s0, [#allocation14]  }
  0x5a   :  { %s4954_s29 = scalar_lea.hbm %s5958_s19, 32 }
  0x5b   :  { %p4955_p4 = scmp.ne.s32.totalorder %s5958_s19, %s4954_s29  ;;  %p4958_p5 = scmp.lt.u32.totalorder %s4954_s29, %s5958_s19 }
  0x5d   :  { %p4960_p6 = pnand %p4958_p5, %p4955_p4 }
  0x5f   :  { %4963 = shalt.err (!%p4960_p6)
}
  0x60   :  { %s4964_s8 = scalar_lea.vmem %s168_s21, 32  ;;  %p4969_p8 = scmp.lt.s32.totalorder %s168_s21, %s168_s21 }
  0x61   :  { %p4965_p7 = scmp.ne.s32.totalorder %s168_s21, %s4964_s8  ;;  %p4970_p9 = scmp.lt.s32.totalorder %s4964_s8, %s4964_s8 }
  0x63   :  { %p4971_p10 = por %p4970_p9, %p4969_p8 }
  0x65   :  { %p4972_p11 = pnand %p4971_p10, %p4965_p7 }
  0x67   :  { %4975 = shalt.err (!%p4972_p11)
}
  0x68   :  { %170 = dma.hbm_to_vmem [thread:$0]  %s5958_s19, 32, %s168_s21, [#allocation17]  }
  0x69   :  { %s5129_s27 = smov [#allocation2]   ;;  %s5130_s15 = smov [#allocation6]  }
  0x6a   :  { %s54_s4 = sshll.u32 %s5129_s27, 4  ;;  %s82_s3 = sshll.u32 %s5130_s15, 4  ;;  %s55_s4 = int_to_ptr.vmem [resolvable:$true] %s54_s4  ;;  %s83_s3 = int_to_ptr.vmem [resolvable:$true] %s82_s3 }
  0x6b   :  { %s5984_s2 = sld [smem:[#allocation31_spill]] }
  0x71   :  { %s4976_s29 = scalar_lea.hbm %s5984_s2, 4096 }
  0x72   :  { %p4977_p12 = scmp.ne.s32.totalorder %s5984_s2, %s4976_s29  ;;  %p4980_p13 = scmp.lt.u32.totalorder %s4976_s29, %s5984_s2 }
  0x74   :  { %p4982_p0 = pnand %p4980_p13, %p4977_p12 }
  0x76   :  { %4985 = shalt.err (!%p4982_p0)
}
  0x77   :  { %s4986_s19 = scalar_lea.vmem %s55_s4, 4096  ;;  %p4991_p2 = scmp.lt.s32.totalorder %s55_s4, %s55_s4 }
  0x78   :  { %p4987_p1 = scmp.ne.s32.totalorder %s55_s4, %s4986_s19  ;;  %p4992_p3 = scmp.lt.s32.totalorder %s4986_s19, %s4986_s19 }
  0x7a   :  { %p4993_p4 = por %p4992_p3, %p4991_p2 }
  0x7c   :  { %p4994_p5 = pnand %p4993_p4, %p4987_p1 }
  0x7e   :  { %4997 = shalt.err (!%p4994_p5)
}
  0x7f   :  { %60 = dma.hbm_to_vmem [thread:$0]  %s5984_s2, 4096, %s55_s4, [#allocation3], %s5121_s28, %s5121_s28, %s5122_s9  }
  0x80   :  { %s4998_s27 = scalar_lea.hbm %s5949_s10, 1024 }
  0x81   :  { %p4999_p6 = scmp.ne.s32.totalorder %s5949_s10, %s4998_s27  ;;  %p5002_p7 = scmp.lt.u32.totalorder %s4998_s27, %s5949_s10 }
  0x83   :  { %p5004_p8 = pnand %p5002_p7, %p4999_p6 }
  0x85   :  { %5007 = shalt.err (!%p5004_p8)
}
  0x86   :  { %s5008_s22 = scalar_lea.vmem %s83_s3, 1024  ;;  %p5013_p10 = scmp.lt.s32.totalorder %s83_s3, %s83_s3 }
  0x87   :  { %p5009_p9 = scmp.ne.s32.totalorder %s83_s3, %s5008_s22  ;;  %p5014_p11 = scmp.lt.s32.totalorder %s5008_s22, %s5008_s22 }
  0x89   :  { %p5015_p12 = por %p5014_p11, %p5013_p10 }
  0x8b   :  { %p5016_p13 = pnand %p5015_p12, %p5009_p9 }
  0x8d   :  { %5019 = shalt.err (!%p5016_p13)
}
  0x8e   :  { %88 = dma.hbm_to_vmem [thread:$0]  %s5949_s10, 1024, %s83_s3, [#allocation5], %s5125_s7, %s5125_s7, %s5126_s5  }
  0x8f   :  { %s5131_s30 = smov [#allocation9]   ;;  %s5132_s1 = smov [#allocation12]  }
  0x90   :  { %s110_s26 = sshll.u32 %s5131_s30, 4  ;;  %s132_s19 = sshll.u32 %s5132_s1, 4  ;;  %s111_s26 = int_to_ptr.vmem [resolvable:$true] %s110_s26  ;;  %s133_s19 = int_to_ptr.vmem [resolvable:$true] %s132_s19 }
  0x91   :  { %s5020_s17 = scalar_lea.hbm %s5953_s14, 6144 }
  0x92   :  { %p5021_p0 = scmp.ne.s32.totalorder %s5953_s14, %s5020_s17  ;;  %p5024_p1 = scmp.lt.u32.totalorder %s5020_s17, %s5953_s14 }
  0x94   :  { %p5026_p2 = pnand %p5024_p1, %p5021_p0 }
  0x96   :  { %5029 = shalt.err (!%p5026_p2)
}
  0x97   :  { %s5030_s10 = scalar_lea.vmem %s111_s26, 6144  ;;  %p5035_p4 = scmp.lt.s32.totalorder %s111_s26, %s111_s26 }
  0x98   :  { %p5031_p3 = scmp.ne.s32.totalorder %s111_s26, %s5030_s10  ;;  %p5036_p5 = scmp.lt.s32.totalorder %s5030_s10, %s5030_s10 }
  0x9a   :  { %p5037_p6 = por %p5036_p5, %p5035_p4 }
  0x9c   :  { %p5038_p7 = pnand %p5037_p6, %p5031_p3 }
  0x9e   :  { %5041 = shalt.err (!%p5038_p7)
}
  0x9f   :  { %116 = dma.hbm_to_vmem [thread:$0]  %s5953_s14, 6144, %s111_s26, [#allocation8], %s5121_s28, %s5121_s28, %s5122_s9  }
  0xa0   :  { %s5042_s29 = scalar_lea.hbm %s5955_s16, 4096 }
  0xa1   :  { %p5043_p8 = scmp.ne.s32.totalorder %s5955_s16, %s5042_s29  ;;  %p5046_p9 = scmp.lt.u32.totalorder %s5042_s29, %s5955_s16 }
  0xa3   :  { %p5048_p10 = pnand %p5046_p9, %p5043_p8 }
  0xa5   :  { %5051 = shalt.err (!%p5048_p10)
}
  0xa6   :  { %s5052_s1 = scalar_lea.vmem %s133_s19, 4096  ;;  %p5057_p12 = scmp.lt.s32.totalorder %s133_s19, %s133_s19 }
  0xa7   :  { %p5053_p11 = scmp.ne.s32.totalorder %s133_s19, %s5052_s1  ;;  %p5058_p13 = scmp.lt.s32.totalorder %s5052_s1, %s5052_s1 }
  0xa9   :  { %p5059_p0 = por %p5058_p13, %p5057_p12 }
  0xab   :  { %p5060_p1 = pnand %p5059_p0, %p5053_p11 }
  0xad   :  { %5063 = shalt.err (!%p5060_p1)
}
  0xae   :  { %138 = dma.hbm_to_vmem [thread:$0]  %s5955_s16, 4096, %s133_s19, [#allocation11], %s5121_s28, %s5121_s28, %s5122_s9  }
  0xaf   :  { %s5133_s21 = smov [#allocation15]   ;;  %s5134_s17 = smov [#allocation18]  }
  0xb0   :  { %s154_s8 = sshll.u32 %s5133_s21, 4  ;;  %s176_s0 = sshll.u32 %s5134_s17, 4  ;;  %s155_s8 = int_to_ptr.vmem [resolvable:$true] %s154_s8  ;;  %s177_s0 = int_to_ptr.vmem [resolvable:$true] %s176_s0 }
  0xb1   :  { %s5064_s12 = scalar_lea.hbm %s5957_s18, 4096 }
  0xb2   :  { %p5065_p2 = scmp.ne.s32.totalorder %s5957_s18, %s5064_s12  ;;  %p5068_p3 = scmp.lt.u32.totalorder %s5064_s12, %s5957_s18 }
  0xb4   :  { %p5070_p4 = pnand %p5068_p3, %p5065_p2 }
  0xb6   :  { %5073 = shalt.err (!%p5070_p4)
}
  0xb7   :  { %s5074_s16 = scalar_lea.vmem %s155_s8, 4096  ;;  %p5079_p6 = scmp.lt.s32.totalorder %s155_s8, %s155_s8 }
  0xb8   :  { %p5075_p5 = scmp.ne.s32.totalorder %s155_s8, %s5074_s16  ;;  %p5080_p7 = scmp.lt.s32.totalorder %s5074_s16, %s5074_s16 }
  0xba   :  { %p5081_p8 = por %p5080_p7, %p5079_p6 }
  0xbc   :  { %p5082_p9 = pnand %p5081_p8, %p5075_p5 }
  0xbe   :  { %5085 = shalt.err (!%p5082_p9)
}
  0xbf   :  { %160 = dma.hbm_to_vmem [thread:$0]  %s5957_s18, 4096, %s155_s8, [#allocation14], %s5121_s28, %s5121_s28, %s5122_s9  }
  0xc0   :  { %s5086_s4 = scalar_lea.hbm %s5959_s20, 12288 }
  0xc1   :  { %p5087_p10 = scmp.ne.s32.totalorder %s5959_s20, %s5086_s4  ;;  %p5090_p11 = scmp.lt.u32.totalorder %s5086_s4, %s5959_s20 }
  0xc3   :  { %p5092_p12 = pnand %p5090_p11, %p5087_p10 }
  0xc5   :  { %5095 = shalt.err (!%p5092_p12)
}
  0xc6   :  { %s5096_s26 = scalar_lea.vmem %s177_s0, 12288  ;;  %p5101_p0 = scmp.lt.s32.totalorder %s177_s0, %s177_s0 }
  0xc7   :  { %p5097_p13 = scmp.ne.s32.totalorder %s177_s0, %s5096_s26  ;;  %p5102_p1 = scmp.lt.s32.totalorder %s5096_s26, %s5096_s26 }
  0xc9   :  { %p5103_p2 = por %p5102_p1, %p5101_p0 }
  0xcb   :  { %p5104_p3 = pnand %p5103_p2, %p5097_p13 }
  0xcd   :  { %5107 = shalt.err (!%p5104_p3)
}
  0xce   :  { %s5135_s18 = smov 384   ;;  %s5136_s28 = smov 24  }
  0xcf   :  { %182 = dma.hbm_to_vmem [thread:$0]  %s5959_s20, 12288, %s177_s0, [#allocation17], %s5135_s18, %s5135_s18, %s5136_s28  }
  0xd0   :  { %5108 = dma.done.wait [#allocation3], 4096  }
  0xd1   :  { %5109 = vsyncadd [#allocation3], 4294963200 }
  0xd2   :  { %5110 = dma.done.wait [#allocation5], 5120  }
  0xd3   :  { %5111 = vsyncadd [#allocation5], 4294962176 }
  0xd4   :  { %5112 = dma.done.wait [#allocation8], 7168  }
  0xd5   :  { %5113 = vsyncadd [#allocation8], 4294960128 }
  0xd6   :  { %5114 = dma.done.wait [#allocation11], 4128  }
  0xd7   :  { %5115 = vsyncadd [#allocation11], 4294963168 }
  0xd8   :  { %5116 = dma.done.wait [#allocation14], 4128  }
  0xd9   :  { %5117 = vsyncadd [#allocation14], 4294963168 }
  0xda   :  { %5118 = dma.done.wait [#allocation17], 12320  }
  0xdb   :  { %5119 = vsyncadd [#allocation17], 4294954976  ;;  %s5985_s27 = sld [smem:[#allocation27_spill]]  ;;  %s5986_s12 = sld [smem:[#allocation25_spill]]  ;;  %vm5138_vm0 = vmmov 0   ;;  %vm1966_vm1 = vcmask 1043456  }
  0xdc   :  { %s5987_s16 = sld [smem:[#allocation29_spill]]  ;;  %s5988_s6 = sld [smem:[#allocation26_spill]]  ;;  %vm2647_vm2 = vcmask 1040384  }
  0xdd   :  { %s5989_s4 = sld [smem:[#allocation28_spill]]  ;;  %s5990_s1 = sld [smem:[#allocation30_spill]] }
  0xde   :  { %s5991_s18 = sld [smem:[#allocation32_spill]]  ;;  %s5992_s8 = sld [smem:[#allocation34_spill]] }
  0xdf   :  { %s5994_s19 = sld [smem:[#allocation36_spill]] }
  0xe1   :  { %v4229_v0 = vld [vmem:[%s5985_s27 + $0x4] ss:$8 sps:$4 sm:$0xff]   ;;  %v4231_v1 = vld [vmem:[%s5985_s27] ss:$8 sps:$4 sm:$0xff]   ;;  %v4232_v2 = vld [vmem:[%s5985_s27 + $0x14] ss:$8 sps:$4 sm:$0xff]  }
  0xe2   :  { %843 = vmatprep.subr.bf16.mxu0 %v4229_v0  ;;  %v4234_v3 = vld [vmem:[%s5985_s27 + $0x10] ss:$8 sps:$4 sm:$0xff]   ;;  %v4235_v4 = vld [vmem:[%s5985_s27 + $0x24] ss:$8 sps:$4 sm:$0xff]   ;;  %v4237_v5 = vld [vmem:[%s5985_s27 + $0x20] ss:$8 sps:$4 sm:$0xff]  }
  0xe3   :  { %844 = vmatpush1.bf16.msra.mxu0 %v4231_v1  ;;  %v4238_v6 = vld [vmem:[%s5985_s27 + $0x34] ss:$8 sps:$4 sm:$0xff]   ;;  %v4240_v7 = vld [vmem:[%s5985_s27 + $0x30] ss:$8 sps:$4 sm:$0xff]   ;;  %v4241_v8 = vld [vmem:[%s5985_s27 + $0x44] ss:$8 sps:$4 sm:$0xff]  }
  0xe4   :  { %845 = vmatprep.subr.bf16.mxu0 %v4232_v2  ;;  %v4243_v9 = vld [vmem:[%s5985_s27 + $0x40] ss:$8 sps:$4 sm:$0xff]   ;;  %v4244_v10 = vld [vmem:[%s5985_s27 + $0x54] ss:$8 sps:$4 sm:$0xff]   ;;  %v4246_v11 = vld [vmem:[%s5985_s27 + $0x50] ss:$8 sps:$4 sm:$0xff]  }
  0xe5   :  { %v4247_v12 = vld [vmem:[%s5985_s27 + $0x64] ss:$8 sps:$4 sm:$0xff]   ;;  %v4249_v14 = vld [vmem:[%s5985_s27 + $0x60] ss:$8 sps:$4 sm:$0xff]   ;;  %v4250_v15 = vld [vmem:[%s5985_s27 + $0x74] ss:$8 sps:$4 sm:$0xff]  }
  0xe6   :  { %v4279_v13 = vld [vmem:[%s5986_s12 + $0x4] ss:$24 sps:$4 sm:$0xff]   ;;  %v4252_v16 = vld [vmem:[%s5985_s27 + $0x70] ss:$8 sps:$4 sm:$0xff]   ;;  %v4255_v18 = vld [vmem:[%s5985_s27 + $0x80] ss:$8 sps:$4 sm:$0xff]  }
  0xe7   :  { %846 = vmatpush1.bf16.msra.mxu0 %v4234_v3  ;;  %875 = vmatprep.mubr.bf16.mxu0 %v4279_v13  ;;  %v4253_v17 = vld [vmem:[%s5985_s27 + $0x84] ss:$8 sps:$4 sm:$0xff]   ;;  %v4256_v19 = vld [vmem:[%s5985_s27 + $0x94] ss:$8 sps:$4 sm:$0xff]   ;;  %v4258_v20 = vld [vmem:[%s5985_s27 + $0x90] ss:$8 sps:$4 sm:$0xff]  }
  0xe8   :  { %847 = vmatprep.subr.bf16.mxu0 %v4235_v4  ;;  %v4259_v21 = vld [vmem:[%s5985_s27 + $0xa4] ss:$8 sps:$4 sm:$0xff]   ;;  %v4261_v22 = vld [vmem:[%s5985_s27 + $0xa0] ss:$8 sps:$4 sm:$0xff]   ;;  %v4262_v23 = vld [vmem:[%s5985_s27 + $0xb4] ss:$8 sps:$4 sm:$0xff]  }
  0xe9   :  { %v4264_v24 = vld [vmem:[%s5985_s27 + $0xb0] ss:$8 sps:$4 sm:$0xff]   ;;  %v4265_v25 = vld [vmem:[%s5985_s27 + $0xc4] ss:$8 sps:$4 sm:$0xff]   ;;  %v4267_v26 = vld [vmem:[%s5985_s27 + $0xc0] ss:$8 sps:$4 sm:$0xff]  }
  0xea   :  { %v4268_v27 = vld [vmem:[%s5985_s27 + $0xd4] ss:$8 sps:$4 sm:$0xff]   ;;  %v4270_v28 = vld [vmem:[%s5985_s27 + $0xd0] ss:$8 sps:$4 sm:$0xff]   ;;  %v4271_v29 = vld [vmem:[%s5985_s27 + $0xe4] ss:$8 sps:$4 sm:$0xff]  }
  0xeb   :  { %848 = vmatpush1.bf16.msra.mxu0 %v4237_v5  ;;  %v4273_v30 = vld [vmem:[%s5985_s27 + $0xe0] ss:$8 sps:$4 sm:$0xff]   ;;  %v4274_v31 = vld [vmem:[%s5985_s27 + $0xf4] ss:$8 sps:$4 sm:$0xff]   ;;  %v4276_v32 = vld [vmem:[%s5985_s27 + $0xf0] ss:$8 sps:$4 sm:$0xff]  }
  0xec   :  { %849 = vmatprep.subr.bf16.mxu0 %v4238_v6  ;;  %v4282_v33 = vld [vmem:[%s5985_s27 + $0x104] ss:$8 sps:$4 sm:$0xff]   ;;  %v4277_v34 = vld [vmem:[%s5986_s12] ss:$24 sps:$4 sm:$0xff]   ;;  %v4285_v37 = vld [vmem:[%s5985_s27 + $0x114] ss:$8 sps:$4 sm:$0xff]  }
  0xed   :  { %v4280_v35 = vld [vmem:[%s5985_s27 + $0x100] ss:$8 sps:$4 sm:$0xff]   ;;  %v4330_v36 = vld [vmem:[%s5986_s12 + $0xc] ss:$24 sps:$4 sm:$0xff]   ;;  %v4283_v38 = vld [vmem:[%s5985_s27 + $0x110] ss:$8 sps:$4 sm:$0xff]  }
  0xee   :  { %v4288_v39 = vld [vmem:[%s5985_s27 + $0x124] ss:$8 sps:$4 sm:$0xff]   ;;  %v4384_v41 = vld [vmem:[%s5987_s16] ss:$8 sps:$4 sm:$0xff]   ;;  %v4385_v43 = vld [vmem:[%s5987_s16 + $0x14] ss:$8 sps:$4 sm:$0xff]  }
  0xef   :  { %850 = vmatpush1.bf16.msra.mxu0 %v4240_v7  ;;  %v4382_v40 = vld [vmem:[%s5987_s16 + $0x4] ss:$8 sps:$4 sm:$0xff]   ;;  %v4286_v42 = vld [vmem:[%s5985_s27 + $0x120] ss:$8 sps:$4 sm:$0xff]   ;;  %v4291_v44 = vld [vmem:[%s5985_s27 + $0x134] ss:$8 sps:$4 sm:$0xff]  }
  0xf0   :  { %851 = vmatprep.subr.bf16.mxu0 %v4241_v8  ;;  %1182 = vmatprep.subr.bf16.mxu1 %v4382_v40  ;;  %v4387_v45 = vld [vmem:[%s5987_s16 + $0x10] ss:$8 sps:$4 sm:$0xff]   ;;  %v4388_v46 = vld [vmem:[%s5987_s16 + $0x24] ss:$8 sps:$4 sm:$0xff]   ;;  %v4390_v49 = vld [vmem:[%s5987_s16 + $0x20] ss:$8 sps:$4 sm:$0xff]  }
  0xf1   :  { %1183 = vmatpush1.bf16.msra.mxu1 %v4384_v41  ;;  %v4289_v47 = vld [vmem:[%s5985_s27 + $0x130] ss:$8 sps:$4 sm:$0xff]   ;;  %v4294_v48 = vld [vmem:[%s5985_s27 + $0x144] ss:$8 sps:$4 sm:$0xff]   ;;  %v4391_v50 = vld [vmem:[%s5987_s16 + $0x34] ss:$8 sps:$4 sm:$0xff]  }
  0xf2   :  { %1184 = vmatprep.subr.bf16.mxu1 %v4385_v43  ;;  %v4292_v51 = vld [vmem:[%s5985_s27 + $0x140] ss:$8 sps:$4 sm:$0xff]   ;;  %v4297_v52 = vld [vmem:[%s5985_s27 + $0x154] ss:$8 sps:$4 sm:$0xff]   ;;  %v4393_v53 = vld [vmem:[%s5987_s16 + $0x30] ss:$8 sps:$4 sm:$0xff]  }
  0xf3   :  { %852 = vmatpush1.bf16.msra.mxu0 %v4243_v9  ;;  %v4394_v54 = vld [vmem:[%s5987_s16 + $0x44] ss:$8 sps:$4 sm:$0xff]   ;;  %v4295_v55 = vld [vmem:[%s5985_s27 + $0x150] ss:$8 sps:$4 sm:$0xff]   ;;  %v4396_v57 = vld [vmem:[%s5987_s16 + $0x40] ss:$8 sps:$4 sm:$0xff]  }
  0xf4   :  { %853 = vmatprep.subr.bf16.mxu0 %v4244_v10  ;;  %v4300_v56 = vld [vmem:[%s5985_s27 + $0x164] ss:$8 sps:$4 sm:$0xff]   ;;  %v4397_v58 = vld [vmem:[%s5987_s16 + $0x54] ss:$8 sps:$4 sm:$0xff]   ;;  %v4298_v59 = vld [vmem:[%s5985_s27 + $0x160] ss:$8 sps:$4 sm:$0xff]  }
  0xf5   :  { %1185 = vmatpush1.bf16.msra.mxu1 %v4387_v45  ;;  %v4303_v60 = vld [vmem:[%s5985_s27 + $0x174] ss:$8 sps:$4 sm:$0xff]   ;;  %v4399_v61 = vld [vmem:[%s5987_s16 + $0x50] ss:$8 sps:$4 sm:$0xff]   ;;  %v4400_v62 = vld [vmem:[%s5987_s16 + $0x64] ss:$8 sps:$4 sm:$0xff]  }
  0xf6   :  { %1186 = vmatprep.subr.bf16.mxu1 %v4388_v46  ;;  %v4301_v63 = vld [vmem:[%s5985_s27 + $0x170] ss:$8 sps:$4 sm:$0xff]   ;;  %v4402_v0 = vld [vmem:[%s5987_s16 + $0x60] ss:$8 sps:$4 sm:$0xff]   ;;  %v4306_v1 = vld [vmem:[%s5985_s27 + $0x184] ss:$8 sps:$4 sm:$0xff]  }
  0xf7   :  { %854 = vmatpush1.bf16.msra.mxu0 %v4246_v11  ;;  %v4403_v2 = vld [vmem:[%s5987_s16 + $0x74] ss:$8 sps:$4 sm:$0xff]   ;;  %v4304_v3 = vld [vmem:[%s5985_s27 + $0x180] ss:$8 sps:$4 sm:$0xff]   ;;  %v4405_v4 = vld [vmem:[%s5987_s16 + $0x70] ss:$8 sps:$4 sm:$0xff]  }
  0xf8   :  { %855 = vmatprep.subr.bf16.mxu0 %v4247_v12  ;;  %v4309_v5 = vld [vmem:[%s5985_s27 + $0x194] ss:$8 sps:$4 sm:$0xff]   ;;  %v4406_v6 = vld [vmem:[%s5987_s16 + $0x84] ss:$8 sps:$4 sm:$0xff]   ;;  %v4307_v7 = vld [vmem:[%s5985_s27 + $0x190] ss:$8 sps:$4 sm:$0xff]  }
  0xf9   :  { %1187 = vmatpush1.bf16.msra.mxu1 %v4390_v49  ;;  %v4408_v8 = vld [vmem:[%s5987_s16 + $0x80] ss:$8 sps:$4 sm:$0xff]   ;;  %v4312_v9 = vld [vmem:[%s5985_s27 + $0x1a4] ss:$8 sps:$4 sm:$0xff]   ;;  %v4409_v10 = vld [vmem:[%s5987_s16 + $0x94] ss:$8 sps:$4 sm:$0xff]  }
  0xfa   :  { %1188 = vmatprep.subr.bf16.mxu1 %v4391_v50  ;;  %v4310_v11 = vld [vmem:[%s5985_s27 + $0x1a0] ss:$8 sps:$4 sm:$0xff]   ;;  %v4411_v12 = vld [vmem:[%s5987_s16 + $0x90] ss:$8 sps:$4 sm:$0xff]   ;;  %v4315_v13 = vld [vmem:[%s5985_s27 + $0x1b4] ss:$8 sps:$4 sm:$0xff]  }
  0xfb   :  { %856 = vmatpush1.bf16.msra.mxu0 %v4249_v14  ;;  %v4412_v14 = vld [vmem:[%s5987_s16 + $0xa4] ss:$8 sps:$4 sm:$0xff]   ;;  %v4343_v41 = vld [vmem:[%s5985_s27 + $0x240] ss:$8 sps:$4 sm:$0xff]   ;;  %v4346_v43 = vld [vmem:[%s5985_s27 + $0x250] ss:$8 sps:$4 sm:$0xff]  }
  0xfc   :  { %857 = vmatprep.subr.bf16.mxu0 %v4250_v15  ;;  %v4313_v15 = vld [vmem:[%s5985_s27 + $0x1b0] ss:$8 sps:$4 sm:$0xff]   ;;  %v4345_v40 = vld [vmem:[%s5985_s27 + $0x244] ss:$8 sps:$4 sm:$0xff]   ;;  %v4349_v45 = vld [vmem:[%s5985_s27 + $0x260] ss:$8 sps:$4 sm:$0xff]  }
  0xfd   :  { %1189 = vmatpush1.bf16.msra.mxu1 %v4393_v53  ;;  %v4354_v46 = vld [vmem:[%s5985_s27 + $0x274] ss:$8 sps:$4 sm:$0xff]   ;;  %v4355_v49 = vld [vmem:[%s5985_s27 + $0x280] ss:$8 sps:$4 sm:$0xff]  }
  0xfe   :  { %1190 = vmatprep.subr.bf16.mxu1 %v4394_v54  ;;  %v4360_v50 = vld [vmem:[%s5985_s27 + $0x294] ss:$8 sps:$4 sm:$0xff]   ;;  %v4361_v53 = vld [vmem:[%s5985_s27 + $0x2a0] ss:$8 sps:$4 sm:$0xff]  }
  0xff   :  { %858 = vmatpush1.bf16.msra.mxu0 %v4252_v16  ;;  %v4414_v16 = vld [vmem:[%s5987_s16 + $0xa0] ss:$8 sps:$4 sm:$0xff]   ;;  %v4366_v54 = vld [vmem:[%s5985_s27 + $0x2b4] ss:$8 sps:$4 sm:$0xff]  }
 0x100   :  { %859 = vmatprep.subr.bf16.mxu0 %v4253_v17  ;;  %v4318_v17 = vld [vmem:[%s5985_s27 + $0x1c4] ss:$8 sps:$4 sm:$0xff]  }
 0x101   :  { %1191 = vmatpush1.bf16.msra.mxu1 %v4396_v57  ;;  %v4367_v57 = vld [vmem:[%s5985_s27 + $0x2c0] ss:$8 sps:$4 sm:$0xff]  }
 0x102   :  { %1192 = vmatprep.subr.bf16.mxu1 %v4397_v58  ;;  %v4372_v58 = vld [vmem:[%s5985_s27 + $0x2d4] ss:$8 sps:$4 sm:$0xff]  }
 0x103   :  { %860 = vmatpush1.bf16.msra.mxu0 %v4255_v18  ;;  %v4415_v18 = vld [vmem:[%s5987_s16 + $0xb4] ss:$8 sps:$4 sm:$0xff]  }
 0x104   :  { %861 = vmatprep.subr.bf16.mxu0 %v4256_v19  ;;  %v4316_v19 = vld [vmem:[%s5985_s27 + $0x1c0] ss:$8 sps:$4 sm:$0xff]  }
 0x105   :  { %1193 = vmatpush1.bf16.msra.mxu1 %v4399_v61  ;;  %v4373_v61 = vld [vmem:[%s5985_s27 + $0x2e0] ss:$8 sps:$4 sm:$0xff]  }
 0x106   :  { %1194 = vmatprep.subr.bf16.mxu1 %v4400_v62  ;;  %v4378_v62 = vld [vmem:[%s5985_s27 + $0x2f4] ss:$8 sps:$4 sm:$0xff]  }
 0x107   :  { %862 = vmatpush1.bf16.msra.mxu0 %v4258_v20  ;;  %v4417_v20 = vld [vmem:[%s5987_s16 + $0xb0] ss:$8 sps:$4 sm:$0xff]  }
 0x108   :  { %863 = vmatprep.subr.bf16.mxu0 %v4259_v21  ;;  %v4321_v21 = vld [vmem:[%s5985_s27 + $0x1d4] ss:$8 sps:$4 sm:$0xff]  }
 0x109   :  { %1195 = vmatpush1.bf16.msra.mxu1 %v4402_v0  ;;  %v4379_v0 = vld [vmem:[%s5986_s12 + $0x10] ss:$24 sps:$4 sm:$0xff]  }
 0x10a   :  { %1196 = vmatprep.subr.bf16.mxu1 %v4403_v2  ;;  %v4424_v2 = vld [vmem:[%s5987_s16 + $0xe4] ss:$8 sps:$4 sm:$0xff]  }
 0x10b   :  { %864 = vmatpush1.bf16.msra.mxu0 %v4261_v22  ;;  %v4418_v22 = vld [vmem:[%s5987_s16 + $0xc4] ss:$8 sps:$4 sm:$0xff]  }
 0x10c   :  { %865 = vmatprep.subr.bf16.mxu0 %v4262_v23  ;;  %v4319_v23 = vld [vmem:[%s5985_s27 + $0x1d0] ss:$8 sps:$4 sm:$0xff]  }
 0x10d   :  { %1197 = vmatpush1.bf16.msra.mxu1 %v4405_v4  ;;  %v4427_v4 = vld [vmem:[%s5987_s16 + $0xf4] ss:$8 sps:$4 sm:$0xff]  }
 0x10e   :  { %1198 = vmatprep.subr.bf16.mxu1 %v4406_v6  ;;  %v4430_v6 = vld [vmem:[#allocation6] sm:$0xff]  }
 0x10f   :  { %866 = vmatpush1.bf16.msra.mxu0 %v4264_v24  ;;  %v4420_v24 = vld [vmem:[%s5987_s16 + $0xc0] ss:$8 sps:$4 sm:$0xff]  }
 0x110   :  { %867 = vmatprep.subr.bf16.mxu0 %v4265_v25  ;;  %v4324_v25 = vld [vmem:[%s5985_s27 + $0x1e4] ss:$8 sps:$4 sm:$0xff]  }
 0x111   :  { %1199 = vmatpush1.bf16.msra.mxu1 %v4408_v8  ;;  %v4431_v8 = vld [vmem:[#allocation6 + $0x8] sm:$0xff]  }
 0x112   :  { %1200 = vmatprep.subr.bf16.mxu1 %v4409_v10  ;;  %v4432_v10 = vld [vmem:[#allocation6 + $0x10] sm:$0xff]  }
 0x113   :  { %868 = vmatpush1.bf16.msra.mxu0 %v4267_v26  ;;  %v4421_v26 = vld [vmem:[%s5987_s16 + $0xd4] ss:$8 sps:$4 sm:$0xff]  }
 0x114   :  { %869 = vmatprep.subr.bf16.mxu0 %v4268_v27  ;;  %v4322_v27 = vld [vmem:[%s5985_s27 + $0x1e0] ss:$8 sps:$4 sm:$0xff]  }
 0x115   :  { %1201 = vmatpush1.bf16.msra.mxu1 %v4411_v12  ;;  %v4434_v12 = vld [vmem:[#allocation6 + $0x20] sm:$0xff]  }
 0x116   :  { %1202 = vmatprep.subr.bf16.mxu1 %v4412_v14  ;;  %v4436_v14 = vld [vmem:[#allocation6 + $0x30] sm:$0xff]  }
 0x117   :  { %870 = vmatpush1.bf16.msra.mxu0 %v4270_v28  ;;  %v4327_v28 = vld [vmem:[%s5985_s27 + $0x1f4] ss:$8 sps:$4 sm:$0xff]  }
 0x118   :  { %871 = vmatprep.subr.bf16.mxu0 %v4271_v29  ;;  %v4325_v29 = vld [vmem:[%s5985_s27 + $0x1f0] ss:$8 sps:$4 sm:$0xff]  }
 0x119   :  { %1203 = vmatpush1.bf16.msra.mxu1 %v4414_v16  ;;  %v4443_v16 = vld [vmem:[#allocation9 + $0x4] ss:$8 sps:$4 sm:$0xff]  }
 0x11a   :  { %1204 = vmatprep.subr.bf16.mxu1 %v4415_v18  ;;  %v1733_v18 = vld [vmem:[%s5988_s6] sm:$0xf] }
 0x11b   :  { %872 = vmatpush1.bf16.msra.mxu0 %v4273_v30  ;;  %v4333_v30 = vld [vmem:[%s5985_s27 + $0x204] ss:$8 sps:$4 sm:$0xff]  }
 0x11c   :  { %873 = vmatprep.subr.bf16.mxu0 %v4274_v31  ;;  %v4328_v31 = vld [vmem:[%s5986_s12 + $0x8] ss:$24 sps:$4 sm:$0xff]  }
 0x11d   :  { %1205 = vmatpush1.bf16.msra.mxu1 %v4417_v20  ;;  %v4447_v20 = vld [vmem:[#allocation9 + $0x10] ss:$8 sps:$4 sm:$0xff]  }
 0x11e   :  { %1206 = vmatprep.subr.bf16.mxu1 %v4418_v22  ;;  %v4453_v22 = vld [vmem:[#allocation9 + $0x20] ss:$8 sps:$4 sm:$0xff]  }
 0x11f   :  { %874 = vmatpush1.bf16.msra.mxu0 %v4276_v32  ;;  %v4331_v32 = vld [vmem:[%s5985_s27 + $0x200] ss:$8 sps:$4 sm:$0xff]  }
 0x120   :  { %886 = vmatprep.subr.bf16.mxu0 %v4282_v33  ;;  %v4381_v33 = vld [vmem:[%s5986_s12 + $0x14] ss:$24 sps:$4 sm:$0xff]   ;;  %s5993_s12 = sld [smem:[#allocation35_spill]] }
 0x121   :  { %1207 = vmatpush1.bf16.msra.mxu1 %v4420_v24  ;;  %v4459_v24 = vld [vmem:[#allocation9 + $0x30] ss:$8 sps:$4 sm:$0xff]  }
 0x122   :  { %876 = vmatmul.mubr.bf16.vlgmr.msra.gmra.mrb[0].mxu0 %v4277_v34  ;;  %1208 = vmatprep.subr.bf16.mxu1 %v4421_v26  ;;  %v4336_v34 = vld [vmem:[%s5985_s27 + $0x214] ss:$8 sps:$4 sm:$0xff]   ;;  %v4465_v26 = vld [vmem:[#allocation9 + $0x40] ss:$8 sps:$4 sm:$0xff]  }
 0x123   :  { %887 = vmatpush1.bf16.msra.mxu0 %v4280_v35  ;;  %918 = vmatprep.mubr.bf16.mxu0 %v4330_v36  ;;  %v4334_v35 = vld [vmem:[%s5985_s27 + $0x210] ss:$8 sps:$4 sm:$0xff]   ;;  %v4339_v36 = vld [vmem:[%s5985_s27 + $0x224] ss:$8 sps:$4 sm:$0xff]  }
 0x124   :  { %888 = vmatprep.subr.bf16.mxu0 %v4285_v37  ;;  %v4337_v37 = vld [vmem:[%s5985_s27 + $0x220] ss:$8 sps:$4 sm:$0xff]  }
 0x127   :  { %889 = vmatpush1.bf16.msra.mxu0 %v4283_v38  ;;  %v4342_v38 = vld [vmem:[%s5985_s27 + $0x234] ss:$8 sps:$4 sm:$0xff]  }
 0x128   :  { %890 = vmatprep.subr.bf16.mxu0 %v4288_v39  ;;  %v4340_v39 = vld [vmem:[%s5985_s27 + $0x230] ss:$8 sps:$4 sm:$0xff]  }
 0x12b   :  { %891 = vmatpush1.bf16.msra.mxu0 %v4286_v42  ;;  %v4348_v42 = vld [vmem:[%s5985_s27 + $0x254] ss:$8 sps:$4 sm:$0xff]  }
 0x12c   :  { %892 = vmatprep.subr.bf16.mxu0 %v4291_v44  ;;  %v4351_v44 = vld [vmem:[%s5985_s27 + $0x264] ss:$8 sps:$4 sm:$0xff]  }
 0x12f   :  { %893 = vmatpush1.bf16.msra.mxu0 %v4289_v47  ;;  %v4352_v47 = vld [vmem:[%s5985_s27 + $0x270] ss:$8 sps:$4 sm:$0xff]  }
 0x130   :  { %894 = vmatprep.subr.bf16.mxu0 %v4294_v48  ;;  %v4357_v48 = vld [vmem:[%s5985_s27 + $0x284] ss:$8 sps:$4 sm:$0xff]  }
 0x133   :  { %895 = vmatpush1.bf16.msra.mxu0 %v4292_v51  ;;  %v4358_v51 = vld [vmem:[%s5985_s27 + $0x290] ss:$8 sps:$4 sm:$0xff]  }
 0x134   :  { %896 = vmatprep.subr.bf16.mxu0 %v4297_v52  ;;  %v4363_v52 = vld [vmem:[%s5985_s27 + $0x2a4] ss:$8 sps:$4 sm:$0xff]  }
 0x137   :  { %897 = vmatpush1.bf16.msra.mxu0 %v4295_v55  ;;  %v4364_v55 = vld [vmem:[%s5985_s27 + $0x2b0] ss:$8 sps:$4 sm:$0xff]  }
 0x138   :  { %898 = vmatprep.subr.bf16.mxu0 %v4300_v56  ;;  %v4369_v56 = vld [vmem:[%s5985_s27 + $0x2c4] ss:$8 sps:$4 sm:$0xff]  }
 0x13b   :  { %899 = vmatpush1.bf16.msra.mxu0 %v4298_v59  ;;  %v4370_v59 = vld [vmem:[%s5985_s27 + $0x2d0] ss:$8 sps:$4 sm:$0xff]  }
 0x13c   :  { %900 = vmatprep.subr.bf16.mxu0 %v4303_v60  ;;  %v4375_v60 = vld [vmem:[%s5985_s27 + $0x2e4] ss:$8 sps:$4 sm:$0xff]  }
 0x13f   :  { %901 = vmatpush1.bf16.msra.mxu0 %v4301_v63  ;;  %v4376_v63 = vld [vmem:[%s5985_s27 + $0x2f0] ss:$8 sps:$4 sm:$0xff]  }
 0x140   :  { %902 = vmatprep.subr.bf16.mxu0 %v4306_v1  ;;  %v4423_v1 = vld [vmem:[%s5987_s16 + $0xd0] ss:$8 sps:$4 sm:$0xff]  }
 0x141   :  { %1209 = vmatpush1.bf16.msra.mxu1 %v4423_v1 }
 0x142   :  { %1210 = vmatprep.subr.bf16.mxu1 %v4424_v2  ;;  %v4438_v2 = vld [vmem:[#allocation2] ss:$8 sps:$4 sm:$0xff]  }
 0x143   :  { %903 = vmatpush1.bf16.msra.mxu0 %v4304_v3  ;;  %v4426_v3 = vld [vmem:[%s5987_s16 + $0xe0] ss:$8 sps:$4 sm:$0xff]  }
 0x144   :  { %904 = vmatprep.subr.bf16.mxu0 %v4309_v5  ;;  %v4429_v5 = vld [vmem:[%s5987_s16 + $0xf0] ss:$8 sps:$4 sm:$0xff]  }
 0x145   :  { %1211 = vmatpush1.bf16.msra.mxu1 %v4426_v3  ;;  %v4446_v3 = vld [vmem:[#allocation2 + $0x14] ss:$8 sps:$4 sm:$0xff]  }
 0x146   :  { %1212 = vmatprep.subr.bf16.mxu1 %v4427_v4  ;;  %v4444_v4 = vld [vmem:[#allocation2 + $0x10] ss:$8 sps:$4 sm:$0xff]  }
 0x147   :  { %905 = vmatpush1.bf16.msra.mxu0 %v4307_v7  ;;  %v5137_v7 = vmov 0.0  }
 0x148   :  { %906 = vmatprep.subr.bf16.mxu0 %v4312_v9  ;;  %v4440_v9 = vld [vmem:[#allocation2 + $0x4] ss:$8 sps:$4 sm:$0xff]  }
 0x149   :  { %1213 = vmatpush1.bf16.msra.mxu1 %v4429_v5  ;;  %v4452_v5 = vld [vmem:[#allocation2 + $0x24] ss:$8 sps:$4 sm:$0xff]  }
 0x14a   :  { %1431 = vmatprep.subr.bf16.mxu1 %v4440_v9  ;;  %v4456_v9 = vld [vmem:[#allocation2 + $0x30] ss:$8 sps:$4 sm:$0xff]  }
 0x14b   :  { %907 = vmatpush1.bf16.msra.mxu0 %v4310_v11  ;;  %v4433_v11 = vld [vmem:[#allocation6 + $0x18] sm:$0xff]  }
 0x14c   :  { %908 = vmatprep.subr.bf16.mxu0 %v4315_v13  ;;  %v4435_v13 = vld [vmem:[#allocation6 + $0x28] sm:$0xff]  }
 0x14f   :  { %909 = vmatpush1.bf16.msra.mxu0 %v4313_v15  ;;  %v4437_v15 = vld [vmem:[#allocation6 + $0x38] sm:$0xff]  }
 0x150   :  { %910 = vmatprep.subr.bf16.mxu0 %v4318_v17  ;;  %v4441_v17 = vld [vmem:[#allocation9] ss:$8 sps:$4 sm:$0xff]  }
 0x153   :  { %911 = vmatpush1.bf16.msra.mxu0 %v4316_v19  ;;  %v4449_v19 = vld [vmem:[#allocation9 + $0x14] ss:$8 sps:$4 sm:$0xff]  }
 0x154   :  { %912 = vmatprep.subr.bf16.mxu0 %v4321_v21  ;;  %v4455_v21 = vld [vmem:[#allocation9 + $0x24] ss:$8 sps:$4 sm:$0xff]  }
 0x157   :  { %913 = vmatpush1.bf16.msra.mxu0 %v4319_v23  ;;  %v4461_v23 = vld [vmem:[#allocation9 + $0x34] ss:$8 sps:$4 sm:$0xff]  }
 0x158   :  { %914 = vmatprep.subr.bf16.mxu0 %v4324_v25  ;;  %v4467_v25 = vld [vmem:[#allocation9 + $0x44] ss:$8 sps:$4 sm:$0xff]  }
 0x15b   :  { %915 = vmatpush1.bf16.msra.mxu0 %v4322_v27  ;;  %v4473_v27 = vld [vmem:[#allocation9 + $0x54] ss:$8 sps:$4 sm:$0xff]  }
 0x15c   :  { %916 = vmatprep.subr.bf16.mxu0 %v4327_v28  ;;  %v4471_v28 = vld [vmem:[#allocation9 + $0x50] ss:$8 sps:$4 sm:$0xff]  }
 0x15f   :  { %917 = vmatpush1.bf16.msra.mxu0 %v4325_v29  ;;  %v4479_v29 = vld [vmem:[#allocation9 + $0x64] ss:$8 sps:$4 sm:$0xff]  }
 0x160   :  { %929 = vmatprep.subr.bf16.mxu0 %v4333_v30  ;;  %v4477_v30 = vld [vmem:[#allocation9 + $0x60] ss:$8 sps:$4 sm:$0xff]  }
 0x162   :  { %919 = vmatmul.mubr.bf16.vlgmr.msra.gmra.mrb[0].mxu0 %v4328_v31  ;;  %v4485_v31 = vld [vmem:[#allocation9 + $0x74] ss:$8 sps:$4 sm:$0xff]  }
 0x163   :  { %930 = vmatpush1.bf16.msra.mxu0 %v4331_v32  ;;  %961 = vmatprep.mubr.bf16.mxu0 %v4381_v33  ;;  %v4483_v32 = vld [vmem:[#allocation9 + $0x70] ss:$8 sps:$4 sm:$0xff]   ;;  %v4491_v33 = vld [vmem:[#allocation9 + $0x84] ss:$8 sps:$4 sm:$0xff]  }
 0x164   :  { %931 = vmatprep.subr.bf16.mxu0 %v4336_v34  ;;  %v4489_v34 = vld [vmem:[#allocation9 + $0x80] ss:$8 sps:$4 sm:$0xff]  }
 0x167   :  { %932 = vmatpush1.bf16.msra.mxu0 %v4334_v35  ;;  %v4497_v35 = vld [vmem:[#allocation9 + $0x94] ss:$8 sps:$4 sm:$0xff]  }
 0x168   :  { %933 = vmatprep.subr.bf16.mxu0 %v4339_v36  ;;  %v4495_v36 = vld [vmem:[#allocation9 + $0x90] ss:$8 sps:$4 sm:$0xff]  }
 0x16b   :  { %934 = vmatpush1.bf16.msra.mxu0 %v4337_v37  ;;  %v4503_v37 = vld [vmem:[#allocation9 + $0xa4] ss:$8 sps:$4 sm:$0xff]  }
 0x16c   :  { %935 = vmatprep.subr.bf16.mxu0 %v4342_v38  ;;  %v4501_v38 = vld [vmem:[#allocation9 + $0xa0] ss:$8 sps:$4 sm:$0xff]  }
 0x16f   :  { %936 = vmatpush1.bf16.msra.mxu0 %v4340_v39  ;;  %v4509_v39 = vld [vmem:[#allocation9 + $0xb4] ss:$8 sps:$4 sm:$0xff]  }
 0x170   :  { %937 = vmatprep.subr.bf16.mxu0 %v4345_v40  ;;  %v4507_v40 = vld [vmem:[#allocation9 + $0xb0] ss:$8 sps:$4 sm:$0xff]  }
 0x173   :  { %938 = vmatpush1.bf16.msra.mxu0 %v4343_v41  ;;  %v4515_v41 = vld [vmem:[#allocation9 + $0xc4] ss:$8 sps:$4 sm:$0xff]  }
 0x174   :  { %939 = vmatprep.subr.bf16.mxu0 %v4348_v42  ;;  %v4513_v42 = vld [vmem:[#allocation9 + $0xc0] ss:$8 sps:$4 sm:$0xff]  }
 0x177   :  { %940 = vmatpush1.bf16.msra.mxu0 %v4346_v43  ;;  %v4521_v43 = vld [vmem:[#allocation9 + $0xd4] ss:$8 sps:$4 sm:$0xff]  }
 0x178   :  { %941 = vmatprep.subr.bf16.mxu0 %v4351_v44  ;;  %v4519_v44 = vld [vmem:[#allocation9 + $0xd0] ss:$8 sps:$4 sm:$0xff]  }
 0x17b   :  { %942 = vmatpush1.bf16.msra.mxu0 %v4349_v45  ;;  %v323_v45 = vlaneseq }
 0x17c   :  { %943 = vmatprep.subr.bf16.mxu0 %v4354_v46 }
 0x17d   :  { %v5839_v46 = vshrl.u32 %v323_v45, 7 }
 0x17f   :  { %944 = vmatpush1.bf16.msra.mxu0 %v4352_v47  ;;  %v5842_v47 = vsub.s32 0, %v5839_v46 }
 0x180   :  { %945 = vmatprep.subr.bf16.mxu0 %v4357_v48  ;;  %v321_v48 = vld [vmem:[%s5989_s4] sm:$0x3] }
 0x183   :  { %946 = vmatpush1.bf16.msra.mxu0 %v4355_v49  ;;  %v5848_v49 = vsub.s32 1, %v5839_v46 }
 0x184   :  { %947 = vmatprep.subr.bf16.mxu0 %v4360_v50  ;;  %v326_v50 = vrot.slane %v321_v48, %v5842_v47 }
 0x187   :  { %948 = vmatpush1.bf16.msra.mxu0 %v4358_v51  ;;  %v330_v51 = vrot.slane %v321_v48, %v5848_v49 }
 0x188   :  { %949 = vmatprep.subr.bf16.mxu0 %v4363_v52 }
 0x18b   :  { %950 = vmatpush1.bf16.msra.mxu0 %v4361_v53 }
 0x18c   :  { %951 = vmatprep.subr.bf16.mxu0 %v4366_v54 }
 0x18f   :  { %952 = vmatpush1.bf16.msra.mxu0 %v4364_v55 }
 0x190   :  { %953 = vmatprep.subr.bf16.mxu0 %v4369_v56 }
 0x193   :  { %954 = vmatpush1.bf16.msra.mxu0 %v4367_v57 }
 0x194   :  { %955 = vmatprep.subr.bf16.mxu0 %v4372_v58 }
 0x197   :  { %956 = vmatpush1.bf16.msra.mxu0 %v4370_v59 }
 0x198   :  { %957 = vmatprep.subr.bf16.mxu0 %v4375_v60 }
 0x19b   :  { %958 = vmatpush1.bf16.msra.mxu0 %v4373_v61 }
 0x19c   :  { %959 = vmatprep.subr.bf16.mxu0 %v4378_v62 }
 0x19f   :  { %960 = vmatpush1.bf16.msra.mxu0 %v4376_v63 }
 0x1a0   :  { %4150 = vmatprep.subr.bf16.mxu0 %v5137_v7 }
 0x1a2   :  { %962 = vmatmul.mubr.bf16.vlgmr.msra.gmra.mrb[0].mxu0 %v4379_v0 }
 0x1a3   :  { %4151 = vmatpush3.bf16.msra.mxu0 %v4430_v6  ;;  %4166 = vmatprep.mubr.msk.bf16.mxu0 %vm5138_vm0, %v5137_v7  ;;  %v4450_v6 = vld [vmem:[#allocation2 + $0x20] ss:$8 sps:$4 sm:$0xff]  }
 0x1a4   :  { %4152 = vmatprep.subr.bf16.mxu0 %v5137_v7 }
 0x1a7   :  { %4153 = vmatpush3.bf16.msra.mxu0 %v4431_v8  ;;  %v4458_v8 = vld [vmem:[#allocation2 + $0x34] ss:$8 sps:$4 sm:$0xff]  }
 0x1a8   :  { %4154 = vmatprep.subr.bf16.mxu0 %v5137_v7 }
 0x1ab   :  { %4155 = vmatpush3.bf16.msra.mxu0 %v4432_v10  ;;  %v4464_v10 = vld [vmem:[#allocation2 + $0x44] ss:$8 sps:$4 sm:$0xff]  }
 0x1ac   :  { %4156 = vmatprep.subr.bf16.mxu0 %v5137_v7 }
 0x1af   :  { %4157 = vmatpush3.bf16.msra.mxu0 %v4433_v11  ;;  %v4462_v11 = vld [vmem:[#allocation2 + $0x40] ss:$8 sps:$4 sm:$0xff]  }
 0x1b0   :  { %4158 = vmatprep.subr.bf16.mxu0 %v5137_v7 }
 0x1b3   :  { %4159 = vmatpush3.bf16.msra.mxu0 %v4434_v12  ;;  %v4470_v12 = vld [vmem:[#allocation2 + $0x54] ss:$8 sps:$4 sm:$0xff]  }
 0x1b4   :  { %4160 = vmatprep.subr.bf16.mxu0 %v5137_v7 }
 0x1b7   :  { %4161 = vmatpush3.bf16.msra.mxu0 %v4435_v13  ;;  %v4468_v13 = vld [vmem:[#allocation2 + $0x50] ss:$8 sps:$4 sm:$0xff]  }
 0x1b8   :  { %4162 = vmatprep.subr.bf16.mxu0 %v5137_v7 }
 0x1bb   :  { %4163 = vmatpush3.bf16.msra.mxu0 %v4436_v14  ;;  %v4476_v14 = vld [vmem:[#allocation2 + $0x64] ss:$8 sps:$4 sm:$0xff]  }
 0x1bc   :  { %4164 = vmatprep.subr.bf16.mxu0 %v5137_v7 }
 0x1bf   :  { %4165 = vmatpush3.bf16.msra.mxu0 %v4437_v15  ;;  %v4474_v15 = vld [vmem:[#allocation2 + $0x60] ss:$8 sps:$4 sm:$0xff]  }
 0x1c0   :  { %2271 = vmatprep.subr.bf16.mxu0 %v4443_v16  ;;  %v4482_v16 = vld [vmem:[#allocation2 + $0x74] ss:$8 sps:$4 sm:$0xff]  }
 0x1c2   :  { %4167 = vmatmul.mubr.bf16.vlgmr.msra.gmra.mrb[4].mxu0 %v1733_v18  ;;  %v4488_v18 = vld [vmem:[#allocation2 + $0x84] ss:$8 sps:$4 sm:$0xff]  }
 0x1c3   :  { %2272 = vmatpush1.bf16.msra.mxu0 %v4441_v17  ;;  %v4480_v17 = vld [vmem:[#allocation2 + $0x70] ss:$8 sps:$4 sm:$0xff]  }
 0x1c4   :  { %2273 = vmatprep.subr.bf16.mxu0 %v4449_v19  ;;  %v4486_v19 = vld [vmem:[#allocation2 + $0x80] ss:$8 sps:$4 sm:$0xff]  }
 0x1c7   :  { %2274 = vmatpush1.bf16.msra.mxu0 %v4447_v20  ;;  %v4494_v20 = vld [vmem:[#allocation2 + $0x94] ss:$8 sps:$4 sm:$0xff]  }
 0x1c8   :  { %2275 = vmatprep.subr.bf16.mxu0 %v4455_v21  ;;  %v4492_v21 = vld [vmem:[#allocation2 + $0x90] ss:$8 sps:$4 sm:$0xff]  }
 0x1cb   :  { %2276 = vmatpush1.bf16.msra.mxu0 %v4453_v22  ;;  %v4500_v22 = vld [vmem:[#allocation2 + $0xa4] ss:$8 sps:$4 sm:$0xff]  }
 0x1cc   :  { %2277 = vmatprep.subr.bf16.mxu0 %v4461_v23  ;;  %v4498_v23 = vld [vmem:[#allocation2 + $0xa0] ss:$8 sps:$4 sm:$0xff]  }
 0x1cf   :  { %2278 = vmatpush1.bf16.msra.mxu0 %v4459_v24  ;;  %v4506_v24 = vld [vmem:[#allocation2 + $0xb4] ss:$8 sps:$4 sm:$0xff]  }
 0x1d0   :  { %2279 = vmatprep.subr.bf16.mxu0 %v4467_v25  ;;  %v4504_v25 = vld [vmem:[#allocation2 + $0xb0] ss:$8 sps:$4 sm:$0xff]  }
 0x1d3   :  { %2280 = vmatpush1.bf16.msra.mxu0 %v4465_v26  ;;  %v4512_v26 = vld [vmem:[#allocation2 + $0xc4] ss:$8 sps:$4 sm:$0xff]  }
 0x1d4   :  { %2281 = vmatprep.subr.bf16.mxu0 %v4473_v27  ;;  %v4510_v27 = vld [vmem:[#allocation2 + $0xc0] ss:$8 sps:$4 sm:$0xff]  }
 0x1d7   :  { %2282 = vmatpush1.bf16.msra.mxu0 %v4471_v28  ;;  %v4518_v28 = vld [vmem:[#allocation2 + $0xd4] ss:$8 sps:$4 sm:$0xff]  }
 0x1d8   :  { %2283 = vmatprep.subr.bf16.mxu0 %v4479_v29  ;;  %v4516_v29 = vld [vmem:[#allocation2 + $0xd0] ss:$8 sps:$4 sm:$0xff]  }
 0x1db   :  { %2284 = vmatpush1.bf16.msra.mxu0 %v4477_v30  ;;  %v4524_v30 = vld [vmem:[#allocation2 + $0xe4] ss:$8 sps:$4 sm:$0xff]  }
 0x1dc   :  { %2285 = vmatprep.subr.bf16.mxu0 %v4485_v31  ;;  %v4522_v31 = vld [vmem:[#allocation2 + $0xe0] ss:$8 sps:$4 sm:$0xff]  }
 0x1df   :  { %2286 = vmatpush1.bf16.msra.mxu0 %v4483_v32  ;;  %v4527_v32 = vld [vmem:[#allocation9 + $0xe4] ss:$8 sps:$4 sm:$0xff]  }
 0x1e0   :  { %2287 = vmatprep.subr.bf16.mxu0 %v4491_v33  ;;  %v4525_v33 = vld [vmem:[#allocation9 + $0xe0] ss:$8 sps:$4 sm:$0xff]  }
 0x1e3   :  { %2288 = vmatpush1.bf16.msra.mxu0 %v4489_v34  ;;  %v4530_v34 = vld [vmem:[#allocation2 + $0xf4] ss:$8 sps:$4 sm:$0xff]  }
 0x1e4   :  { %2289 = vmatprep.subr.bf16.mxu0 %v4497_v35  ;;  %v4528_v35 = vld [vmem:[#allocation2 + $0xf0] ss:$8 sps:$4 sm:$0xff]  }
 0x1e7   :  { %2290 = vmatpush1.bf16.msra.mxu0 %v4495_v36  ;;  %v4533_v36 = vld [vmem:[#allocation9 + $0xf4] ss:$8 sps:$4 sm:$0xff]  }
 0x1e8   :  { %2291 = vmatprep.subr.bf16.mxu0 %v4503_v37  ;;  %v4531_v37 = vld [vmem:[#allocation9 + $0xf0] ss:$8 sps:$4 sm:$0xff]  }
 0x1eb   :  { %2292 = vmatpush1.bf16.msra.mxu0 %v4501_v38  ;;  %v4536_v38 = vld [vmem:[#allocation4 + $0x4] ss:$8 sps:$4 sm:$0xff]  }
 0x1ec   :  { %2293 = vmatprep.subr.bf16.mxu0 %v4509_v39  ;;  %v1010_v39 = vld [vmem:[%s5990_s1] sm:$0x3] }
 0x1ef   :  { %2294 = vmatpush1.bf16.msra.mxu0 %v4507_v40  ;;  %v1015_v40 = vrot.slane %v1010_v39, %v5842_v47 }
 0x1f0   :  { %2295 = vmatprep.subr.bf16.mxu0 %v4515_v41  ;;  %v1019_v41 = vrot.slane %v1010_v39, %v5848_v49 }
 0x1f3   :  { %2296 = vmatpush1.bf16.msra.mxu0 %v4513_v42 }
 0x1f4   :  { %2297 = vmatprep.subr.bf16.mxu0 %v4521_v43 }
 0x1f7   :  { %2298 = vmatpush1.bf16.msra.mxu0 %v4519_v44 }
 0x1f8   :  { %2299 = vmatprep.subr.bf16.mxu0 %v4527_v32 }
 0x1fb   :  { %2300 = vmatpush1.bf16.msra.mxu0 %v4525_v33 }
 0x1fc   :  { %2301 = vmatprep.subr.bf16.mxu0 %v4533_v36 }
 0x1ff   :  { %2302 = vmatpush1.bf16.msra.mxu0 %v4531_v37 }
 0x275   :  { %v963_v52 = vpop.f32.mrb[0].mxu0 }
 0x276   :  { %v4190_v53 = vadd.f32 %v963_v52, %v326_v50  ;;  %v965_v54 = vpop.f32.mrb[1].mxu0 }
 0x277   :  { %v4191_v55 = vadd.f32 %v965_v54, %v330_v51  ;;  %v967_v56 = vpop.f32.mrb[2].mxu0  ;;  %v4534_v54 = vld [vmem:[#allocation4] ss:$8 sps:$4 sm:$0xff]  }
 0x278   :  { %v4192_v57 = vadd.f32 %v967_v56, %v326_v50  ;;  %v969_v58 = vpop.f32.mrb[3].mxu0  ;;  %v972_v60 = vmax.f32 %v4190_v53, 0.0  ;;  %v4539_v56 = vld [vmem:[#allocation4 + $0x14] ss:$8 sps:$4 sm:$0xff]  }
 0x279   :  { %v4193_v59 = vadd.f32 %v969_v58, %v330_v51  ;;  %v973_v62 = vmax.f32 %v4191_v55, 0.0 }
 0x27a   :  { %v974_v61 = vmax.f32 %v4192_v57, 0.0 }
 0x27b   :  { %v975_v63 = vmax.f32 %v4193_v59, 0.0  ;;  %v4537_v59 = vld [vmem:[#allocation4 + $0x10] ss:$8 sps:$4 sm:$0xff]  }
 0x27c   :  { %v976_v0 = vpack.c.bf16 %v974_v61, %v972_v60  ;;  %v4542_v60 = vld [vmem:[#allocation4 + $0x24] ss:$8 sps:$4 sm:$0xff]   ;;  %v4540_v61 = vld [vmem:[#allocation4 + $0x20] ss:$8 sps:$4 sm:$0xff]  }
 0x27d   :  { %v977_v1 = vpack.c.bf16 %v975_v63, %v973_v62  ;;  %v4545_v62 = vld [vmem:[#allocation4 + $0x34] ss:$8 sps:$4 sm:$0xff]   ;;  %v4543_v63 = vld [vmem:[#allocation4 + $0x30] ss:$8 sps:$4 sm:$0xff]  }
 0x27f   :  { %1214 = vmatprep.mubr.bf16.mxu1 %v977_v1  ;;  %v4546_v1 = vld [vmem:[#allocation4 + $0x40] ss:$8 sps:$4 sm:$0xff]  }
 0x280   :  { %1215 = vmatmul.mubr.bf16.vlgmr.msra.gmra.mrb[0].mxu1 %v976_v0  ;;  %v4548_v0 = vld [vmem:[#allocation4 + $0x44] ss:$8 sps:$4 sm:$0xff]  }
 0x281   :  { %1432 = vmatpush1.bf16.msra.mxu1 %v4438_v2  ;;  %v4551_v2 = vld [vmem:[#allocation4 + $0x54] ss:$8 sps:$4 sm:$0xff]  }
 0x282   :  { %1433 = vmatprep.subr.bf16.mxu1 %v4446_v3  ;;  %v4549_v3 = vld [vmem:[#allocation4 + $0x50] ss:$8 sps:$4 sm:$0xff]  }
 0x285   :  { %1434 = vmatpush1.bf16.msra.mxu1 %v4444_v4  ;;  %v4554_v4 = vld [vmem:[#allocation4 + $0x64] ss:$8 sps:$4 sm:$0xff]  }
 0x286   :  { %1435 = vmatprep.subr.bf16.mxu1 %v4452_v5  ;;  %v4552_v5 = vld [vmem:[#allocation4 + $0x60] ss:$8 sps:$4 sm:$0xff]  }
 0x289   :  { %1436 = vmatpush1.bf16.msra.mxu1 %v4450_v6  ;;  %v4557_v6 = vld [vmem:[#allocation4 + $0x74] ss:$8 sps:$4 sm:$0xff]  }
 0x28a   :  { %1437 = vmatprep.subr.bf16.mxu1 %v4458_v8  ;;  %v4555_v8 = vld [vmem:[#allocation4 + $0x70] ss:$8 sps:$4 sm:$0xff]  }
 0x28d   :  { %1438 = vmatpush1.bf16.msra.mxu1 %v4456_v9  ;;  %v4560_v9 = vld [vmem:[#allocation4 + $0x84] ss:$8 sps:$4 sm:$0xff]  }
 0x28e   :  { %1439 = vmatprep.subr.bf16.mxu1 %v4464_v10  ;;  %v4558_v10 = vld [vmem:[#allocation4 + $0x80] ss:$8 sps:$4 sm:$0xff]  }
 0x291   :  { %1440 = vmatpush1.bf16.msra.mxu1 %v4462_v11  ;;  %v4563_v11 = vld [vmem:[#allocation4 + $0x94] ss:$8 sps:$4 sm:$0xff]  }
 0x292   :  { %1441 = vmatprep.subr.bf16.mxu1 %v4470_v12  ;;  %v4561_v12 = vld [vmem:[#allocation4 + $0x90] ss:$8 sps:$4 sm:$0xff]  }
 0x295   :  { %1442 = vmatpush1.bf16.msra.mxu1 %v4468_v13  ;;  %v4566_v13 = vld [vmem:[#allocation4 + $0xa4] ss:$8 sps:$4 sm:$0xff]  }
 0x296   :  { %1443 = vmatprep.subr.bf16.mxu1 %v4476_v14  ;;  %v4564_v14 = vld [vmem:[#allocation4 + $0xa0] ss:$8 sps:$4 sm:$0xff]  }
 0x299   :  { %1444 = vmatpush1.bf16.msra.mxu1 %v4474_v15  ;;  %v4569_v15 = vld [vmem:[#allocation4 + $0xb4] ss:$8 sps:$4 sm:$0xff]  }
 0x29a   :  { %1445 = vmatprep.subr.bf16.mxu1 %v4482_v16  ;;  %v4567_v16 = vld [vmem:[#allocation4 + $0xb0] ss:$8 sps:$4 sm:$0xff]  }
 0x29d   :  { %1446 = vmatpush1.bf16.msra.mxu1 %v4480_v17  ;;  %v4572_v17 = vld [vmem:[#allocation4 + $0xc4] ss:$8 sps:$4 sm:$0xff]  }
 0x29e   :  { %1447 = vmatprep.subr.bf16.mxu1 %v4488_v18  ;;  %v4570_v18 = vld [vmem:[#allocation4 + $0xc0] ss:$8 sps:$4 sm:$0xff]  }
 0x2a1   :  { %1448 = vmatpush1.bf16.msra.mxu1 %v4486_v19  ;;  %v4575_v19 = vld [vmem:[#allocation4 + $0xd4] ss:$8 sps:$4 sm:$0xff]  }
 0x2a2   :  { %1449 = vmatprep.subr.bf16.mxu1 %v4494_v20  ;;  %v4573_v20 = vld [vmem:[#allocation4 + $0xd0] ss:$8 sps:$4 sm:$0xff]  }
 0x2a5   :  { %1450 = vmatpush1.bf16.msra.mxu1 %v4492_v21  ;;  %v4578_v21 = vld [vmem:[#allocation4 + $0xe4] ss:$8 sps:$4 sm:$0xff]  }
 0x2a6   :  { %1451 = vmatprep.subr.bf16.mxu1 %v4500_v22  ;;  %v4576_v22 = vld [vmem:[#allocation4 + $0xe0] ss:$8 sps:$4 sm:$0xff]  }
 0x2a9   :  { %1452 = vmatpush1.bf16.msra.mxu1 %v4498_v23  ;;  %v4581_v23 = vld [vmem:[#allocation4 + $0xf4] ss:$8 sps:$4 sm:$0xff]  }
 0x2aa   :  { %1453 = vmatprep.subr.bf16.mxu1 %v4506_v24  ;;  %v4579_v24 = vld [vmem:[#allocation4 + $0xf0] ss:$8 sps:$4 sm:$0xff]  }
 0x2ad   :  { %1454 = vmatpush1.bf16.msra.mxu1 %v4504_v25  ;;  %v1839_v25 = vpop.f32.mrb[4].mxu0 }
 0x2ae   :  { %1455 = vmatprep.subr.bf16.mxu1 %v4512_v26  ;;  %v4168_v26 = vpop.f32.mrb[5].mxu0 }
 0x2af   :  { %v4640_v26 = vld [vmem:[#allocation12 + $0x84] ss:$8 sps:$4 sm:$0xff]  }
 0x2b1   :  { %1456 = vmatpush1.bf16.msra.mxu1 %v4510_v27  ;;  %v1842_v27 = vpop.f32.mrb[6].mxu0 }
 0x2b2   :  { %1457 = vmatprep.subr.bf16.mxu1 %v4518_v28  ;;  %v4169_v28 = vpop.f32.mrb[7].mxu0  ;;  %v4638_v27 = vld [vmem:[#allocation12 + $0x80] ss:$8 sps:$4 sm:$0xff]  }
 0x2b3   :  { %v4643_v28 = vld [vmem:[#allocation12 + $0x94] ss:$8 sps:$4 sm:$0xff]  }
 0x2b5   :  { %1458 = vmatpush1.bf16.msra.mxu1 %v4516_v29  ;;  %v1259_v29 = vld [vmem:[%s5991_s18] sm:$0x3] }
 0x2b6   :  { %1459 = vmatprep.subr.bf16.mxu1 %v4524_v30  ;;  %v1264_v30 = vrot.slane %v1259_v29, %v5842_v47 }
 0x2b9   :  { %1460 = vmatpush1.bf16.msra.mxu1 %v4522_v31  ;;  %v1268_v31 = vrot.slane %v1259_v29, %v5848_v49  ;;  %v4641_v29 = vld [vmem:[#allocation12 + $0x90] ss:$8 sps:$4 sm:$0xff]  }
 0x2ba   :  { %1461 = vmatprep.subr.bf16.mxu1 %v4530_v34 }
 0x2bd   :  { %1462 = vmatpush1.bf16.msra.mxu1 %v4528_v35 }
 0x2be   :  { %1680 = vmatprep.subr.bf16.mxu1 %v4536_v38 }
 0x353   :  { %v1216_v42 = vpop.f32.mrb[0].mxu1 }
 0x354   :  { %v1217_v43 = vadd.f32 %v1216_v42, %v1015_v40  ;;  %v1218_v44 = vpop.f32.mrb[1].mxu1 }
 0x355   :  { %v1219_v45 = vadd.f32 %v1218_v44, %v1019_v41  ;;  %v1220_v48 = vpop.f32.mrb[2].mxu1  ;;  %v4584_v44 = vld [vmem:[#allocation7 + $0x10] sm:$0xff]  }
 0x356   :  { %v1221_v50 = vadd.f32 %v1220_v48, %v1015_v40  ;;  %v1222_v51 = vpop.f32.mrb[3].mxu1  ;;  %v1225_v55 = vpack.c.bf16 %v1217_v43, %v1217_v43  ;;  %v4583_v43 = vld [vmem:[#allocation7 + $0x8] sm:$0xff]   ;;  %v4586_v48 = vld [vmem:[#allocation7 + $0x20] sm:$0xff]  }
 0x357   :  { %v1226_v52 = vpack.c.bf16 %v1219_v45, %v1219_v45  ;;  %v1223_v53 = vadd.f32 %v1222_v51, %v1019_v41  ;;  %v4582_v41 = vld [vmem:[#allocation7] sm:$0xff]   ;;  %v4585_v45 = vld [vmem:[#allocation7 + $0x18] sm:$0xff]  }
 0x358   :  { %v1968_v58 = vpack.c.bf16 %v1221_v50, %v1221_v50  ;;  %v4587_v50 = vld [vmem:[#allocation7 + $0x28] sm:$0xff]   ;;  %v3904_v51 = vld [vmem:[%s5950_s11] ss:$0 sm:$0xff] }
 0x359   :  { %v1969_v57 = vpack.c.bf16 %v1223_v53, %v1223_v53  ;;  %1463 = vmatprep.mubr.bf16.mxu1 %v1226_v52  ;;  %v1840_v52 = vadd.f32 %v3904_v51, %v1839_v25  ;;  %v4588_v53 = vld [vmem:[#allocation7 + $0x30] sm:$0xff]   ;;  %v3913_v51 = vld [vmem:[%s5952_s13] ss:$0 sm:$0xff] }
 0x35a   :  { %1464 = vmatmul.mubr.bf16.vlgmr.msra.gmra.mrb[4].mxu1 %v1225_v55  ;;  %v4589_v55 = vld [vmem:[#allocation7 + $0x38] sm:$0xff]  }
 0x35b   :  { %2303 = vmatprep.mubr.bf16.mxu0 %v1969_v57  ;;  %1681 = vmatpush1.bf16.msra.mxu1 %v4534_v54  ;;  %v1845_v54 = vmax.f32 %v1840_v52, 0.0  ;;  %v4590_v57 = vld [vmem:[#allocation9 + $0x100] ss:$8 sps:$4 sm:$0xff]   ;;  %v4635_v25 = vld [vmem:[#allocation12 + $0x70] ss:$8 sps:$4 sm:$0xff]  }
 0x35c   :  { %2304 = vmatmul.mubr.bf16.vlgmr.msra.gmra.mrb[8].mxu0 %v1968_v58  ;;  %1682 = vmatprep.subr.bf16.mxu1 %v4539_v56  ;;  %v4592_v58 = vld [vmem:[#allocation9 + $0x104] ss:$8 sps:$4 sm:$0xff]  }
 0x35d   :  { %v1846_v56 = vpack.c.bf16 %v1845_v54, %v1845_v54  ;;  %2312 = vmatprep.subr.bf16.mxu0 %v4592_v58 }
 0x35e   :  { %2313 = vmatpush1.bf16.msra.mxu0 %v4590_v57 }
 0x35f   :  { %1683 = vmatpush1.bf16.msra.mxu1 %v4537_v59  ;;  %v4595_v59 = vld [vmem:[#allocation9 + $0x114] ss:$8 sps:$4 sm:$0xff]  }
 0x360   :  { %1684 = vmatprep.subr.bf16.mxu1 %v4542_v60  ;;  %v4593_v60 = vld [vmem:[#allocation9 + $0x110] ss:$8 sps:$4 sm:$0xff]   ;;  %2314 = vmatprep.subr.bf16.mxu0 %v4595_v59 }
 0x362   :  { %2315 = vmatpush1.bf16.msra.mxu0 %v4593_v60 }
 0x363   :  { %1685 = vmatpush1.bf16.msra.mxu1 %v4540_v61  ;;  %v4598_v61 = vld [vmem:[#allocation9 + $0x124] ss:$8 sps:$4 sm:$0xff]  }
 0x364   :  { %1686 = vmatprep.subr.bf16.mxu1 %v4545_v62  ;;  %v4596_v62 = vld [vmem:[#allocation9 + $0x120] ss:$8 sps:$4 sm:$0xff]   ;;  %2316 = vmatprep.subr.bf16.mxu0 %v4598_v61 }
 0x365   :  { %v4658_v61 = vld [vmem:[#allocation12 + $0xe4] ss:$8 sps:$4 sm:$0xff]  }
 0x366   :  { %2317 = vmatpush1.bf16.msra.mxu0 %v4596_v62  ;;  %v4656_v62 = vld [vmem:[#allocation12 + $0xe0] ss:$8 sps:$4 sm:$0xff]  }
 0x367   :  { %1687 = vmatpush1.bf16.msra.mxu1 %v4543_v63  ;;  %v4601_v63 = vld [vmem:[#allocation9 + $0x134] ss:$8 sps:$4 sm:$0xff]  }
 0x368   :  { %1688 = vmatprep.subr.bf16.mxu1 %v4548_v0  ;;  %v4599_v0 = vld [vmem:[#allocation9 + $0x130] ss:$8 sps:$4 sm:$0xff]   ;;  %2318 = vmatprep.subr.bf16.mxu0 %v4601_v63 }
 0x369   :  { %v4661_v63 = vld [vmem:[#allocation12 + $0xf4] ss:$8 sps:$4 sm:$0xff]  }
 0x36a   :  { %2319 = vmatpush1.bf16.msra.mxu0 %v4599_v0  ;;  %v4659_v0 = vld [vmem:[#allocation12 + $0xf0] ss:$8 sps:$4 sm:$0xff]  }
 0x36b   :  { %1689 = vmatpush1.bf16.msra.mxu1 %v4546_v1  ;;  %v4604_v1 = vld [vmem:[#allocation9 + $0x144] ss:$8 sps:$4 sm:$0xff]  }
 0x36c   :  { %1690 = vmatprep.subr.bf16.mxu1 %v4551_v2  ;;  %2320 = vmatprep.subr.bf16.mxu0 %v4604_v1  ;;  %v4607_v2 = vld [vmem:[#allocation9 + $0x154] ss:$8 sps:$4 sm:$0xff]   ;;  %v4664_v1 = vld [vmem:[#allocation15 + $0x4] ss:$8 sps:$4 sm:$0xff]  }
 0x36f   :  { %1691 = vmatpush1.bf16.msra.mxu1 %v4549_v3  ;;  %v4605_v3 = vld [vmem:[#allocation9 + $0x150] ss:$8 sps:$4 sm:$0xff]  }
 0x370   :  { %1692 = vmatprep.subr.bf16.mxu1 %v4554_v4  ;;  %v4610_v4 = vld [vmem:[#allocation9 + $0x164] ss:$8 sps:$4 sm:$0xff]  }
 0x373   :  { %1693 = vmatpush1.bf16.msra.mxu1 %v4552_v5  ;;  %v4608_v5 = vld [vmem:[#allocation9 + $0x160] ss:$8 sps:$4 sm:$0xff]  }
 0x374   :  { %1694 = vmatprep.subr.bf16.mxu1 %v4557_v6  ;;  %v4613_v6 = vld [vmem:[#allocation9 + $0x174] ss:$8 sps:$4 sm:$0xff]  }
 0x377   :  { %1695 = vmatpush1.bf16.msra.mxu1 %v4555_v8  ;;  %v4611_v8 = vld [vmem:[#allocation9 + $0x170] ss:$8 sps:$4 sm:$0xff]  }
 0x378   :  { %1696 = vmatprep.subr.bf16.mxu1 %v4560_v9  ;;  %v5139_v9 = vmov 0  }
 0x379   :  { %2344 = vmatprep.mubr.bf16.mxu0 %v5139_v9 }
 0x37b   :  { %1697 = vmatpush1.bf16.msra.mxu1 %v4558_v10  ;;  %v4614_v10 = vld [vmem:[#allocation12] ss:$8 sps:$4 sm:$0xff]  }
 0x37c   :  { %1698 = vmatprep.subr.bf16.mxu1 %v4563_v11  ;;  %v4616_v11 = vld [vmem:[#allocation12 + $0x4] ss:$8 sps:$4 sm:$0xff]  }
 0x37f   :  { %1699 = vmatpush1.bf16.msra.mxu1 %v4561_v12  ;;  %v4619_v12 = vld [vmem:[#allocation12 + $0x14] ss:$8 sps:$4 sm:$0xff]  }
 0x380   :  { %1700 = vmatprep.subr.bf16.mxu1 %v4566_v13  ;;  %v4617_v13 = vld [vmem:[#allocation12 + $0x10] ss:$8 sps:$4 sm:$0xff]  }
 0x383   :  { %1701 = vmatpush1.bf16.msra.mxu1 %v4564_v14  ;;  %v4622_v14 = vld [vmem:[#allocation12 + $0x24] ss:$8 sps:$4 sm:$0xff]  }
 0x384   :  { %1702 = vmatprep.subr.bf16.mxu1 %v4569_v15  ;;  %v4620_v15 = vld [vmem:[#allocation12 + $0x20] ss:$8 sps:$4 sm:$0xff]  }
 0x387   :  { %1703 = vmatpush1.bf16.msra.mxu1 %v4567_v16  ;;  %v4625_v16 = vld [vmem:[#allocation12 + $0x34] ss:$8 sps:$4 sm:$0xff]  }
 0x388   :  { %1704 = vmatprep.subr.bf16.mxu1 %v4572_v17  ;;  %v4623_v17 = vld [vmem:[#allocation12 + $0x30] ss:$8 sps:$4 sm:$0xff]  }
 0x38b   :  { %1705 = vmatpush1.bf16.msra.mxu1 %v4570_v18  ;;  %v4628_v18 = vld [vmem:[#allocation12 + $0x44] ss:$8 sps:$4 sm:$0xff]  }
 0x38c   :  { %1706 = vmatprep.subr.bf16.mxu1 %v4575_v19  ;;  %v4626_v19 = vld [vmem:[#allocation12 + $0x40] ss:$8 sps:$4 sm:$0xff]  }
 0x38f   :  { %1707 = vmatpush1.bf16.msra.mxu1 %v4573_v20  ;;  %v4631_v20 = vld [vmem:[#allocation12 + $0x54] ss:$8 sps:$4 sm:$0xff]  }
 0x390   :  { %1708 = vmatprep.subr.bf16.mxu1 %v4578_v21  ;;  %v4629_v21 = vld [vmem:[#allocation12 + $0x50] ss:$8 sps:$4 sm:$0xff]  }
 0x393   :  { %1709 = vmatpush1.bf16.msra.mxu1 %v4576_v22  ;;  %v4634_v22 = vld [vmem:[#allocation12 + $0x64] ss:$8 sps:$4 sm:$0xff]  }
 0x394   :  { %1710 = vmatprep.subr.bf16.mxu1 %v4581_v23  ;;  %v4632_v23 = vld [vmem:[#allocation12 + $0x60] ss:$8 sps:$4 sm:$0xff]  }
 0x397   :  { %1711 = vmatpush1.bf16.msra.mxu1 %v4579_v24  ;;  %v4637_v24 = vld [vmem:[#allocation12 + $0x74] ss:$8 sps:$4 sm:$0xff]  }
 0x398   :  { %4170 = vmatprep.subr.bf16.mxu1 %v5137_v7 }
 0x42d   :  { %v1465_v32 = vpop.f32.mrb[4].mxu1 }
 0x42e   :  { %v1466_v33 = vadd.f32 %v1465_v32, %v1264_v30  ;;  %v1467_v34 = vpop.f32.mrb[5].mxu1  ;;  %v4646_v30 = vld [vmem:[#allocation12 + $0xa4] ss:$8 sps:$4 sm:$0xff]   ;;  %v4649_v32 = vld [vmem:[#allocation12 + $0xb4] ss:$8 sps:$4 sm:$0xff]  }
 0x42f   :  { %v1468_v35 = vadd.f32 %v1467_v34, %v1268_v31  ;;  %v1469_v36 = vpop.f32.mrb[6].mxu1  ;;  %v4644_v31 = vld [vmem:[#allocation12 + $0xa0] ss:$8 sps:$4 sm:$0xff]   ;;  %v4652_v34 = vld [vmem:[#allocation12 + $0xc4] ss:$8 sps:$4 sm:$0xff]  }
 0x430   :  { %v1472_v37 = vmax.f32 %v1466_v33, 0.0  ;;  %v1470_v38 = vpop.f32.mrb[7].mxu1  ;;  %v4647_v33 = vld [vmem:[#allocation12 + $0xb0] ss:$8 sps:$4 sm:$0xff]   ;;  %v4655_v36 = vld [vmem:[#allocation12 + $0xd4] ss:$8 sps:$4 sm:$0xff]  }
 0x431   :  { %v1473_v39 = vmax.f32 %v1468_v35, 0.0  ;;  %v4650_v35 = vld [vmem:[#allocation12 + $0xc0] ss:$8 sps:$4 sm:$0xff]   ;;  %v1508_v38 = vld [vmem:[%s5992_s8] sm:$0x3] }
 0x432   :  { %v1474_v42 = vpack.c.bf16 %v1472_v37, %v1472_v37  ;;  %v4653_v37 = vld [vmem:[#allocation12 + $0xd0] ss:$8 sps:$4 sm:$0xff]  }
 0x433   :  { %v1475_v40 = vpack.c.bf16 %v1473_v39, %v1473_v39  ;;  %v1513_v39 = vrot.slane %v1508_v38, %v5842_v47 }
 0x435   :  { %1712 = vmatprep.mubr.bf16.mxu1 %v1475_v40  ;;  %v1517_v40 = vrot.slane %v1508_v38, %v5848_v49  ;;  %v4700_v38 = vld [vmem:[#allocation15 + $0xc4] ss:$8 sps:$4 sm:$0xff]  }
 0x436   :  { %1713 = vmatmul.mubr.bf16.vlgmr.msra.gmra.mrb[8].mxu1 %v1474_v42 }
 0x437   :  { %4171 = vmatpush3.bf16.msra.mxu1 %v4582_v41  ;;  %4186 = vmatprep.mubr.msk.bf16.mxu1 %vm5138_vm0, %v5137_v7 }
 0x438   :  { %4172 = vmatprep.subr.bf16.mxu1 %v5137_v7 }
 0x43b   :  { %4173 = vmatpush3.bf16.msra.mxu1 %v4583_v43 }
 0x43c   :  { %4174 = vmatprep.subr.bf16.mxu1 %v5137_v7 }
 0x43f   :  { %4175 = vmatpush3.bf16.msra.mxu1 %v4584_v44 }
 0x440   :  { %4176 = vmatprep.subr.bf16.mxu1 %v5137_v7 }
 0x443   :  { %4177 = vmatpush3.bf16.msra.mxu1 %v4585_v45 }
 0x444   :  { %4178 = vmatprep.subr.bf16.mxu1 %v5137_v7 }
 0x447   :  { %4179 = vmatpush3.bf16.msra.mxu1 %v4586_v48 }
 0x448   :  { %4180 = vmatprep.subr.bf16.mxu1 %v5137_v7 }
 0x44b   :  { %4181 = vmatpush3.bf16.msra.mxu1 %v4587_v50 }
 0x44c   :  { %4182 = vmatprep.subr.bf16.mxu1 %v5137_v7 }
 0x44f   :  { %4183 = vmatpush3.bf16.msra.mxu1 %v4588_v53 }
 0x450   :  { %4184 = vmatprep.subr.bf16.mxu1 %v5137_v7  ;;  %v4602_v7 = vld [vmem:[#allocation9 + $0x140] ss:$8 sps:$4 sm:$0xff]  }
 0x451   :  { %2321 = vmatpush1.bf16.msra.mxu0 %v4602_v7  ;;  %v2019_v7 = vld [vmem:[#allocation10] sm:$0x3] }
 0x452   :  { %2322 = vmatprep.subr.bf16.mxu0 %v4607_v2  ;;  %v2024_v2 = vrot.slane %v2019_v7, %v5842_v47 }
 0x453   :  { %4185 = vmatpush3.bf16.msra.mxu1 %v4589_v55 }
 0x454   :  { %2561 = vmatprep.subr.bf16.mxu1 %v4616_v11 }
 0x455   :  { %2323 = vmatpush1.bf16.msra.mxu0 %v4605_v3  ;;  %v2028_v3 = vrot.slane %v2019_v7, %v5848_v49  ;;  %v4754_v7 = vld [vmem:[#allocation18 + $0x154] ss:$24 sps:$4 sm:$0xff]  }
 0x456   :  { %4187 = vmatmul.mubr.bf16.vlgmr.msra.gmra.mrb[12].mxu1 %v1846_v56  ;;  %2324 = vmatprep.subr.bf16.mxu0 %v4610_v4 }
 0x457   :  { %2562 = vmatpush1.bf16.msra.mxu1 %v4614_v10 }
 0x458   :  { %2563 = vmatprep.subr.bf16.mxu1 %v4619_v12 }
 0x459   :  { %2325 = vmatpush1.bf16.msra.mxu0 %v4608_v5 }
 0x45a   :  { %2326 = vmatprep.subr.bf16.mxu0 %v4613_v6 }
 0x45b   :  { %2564 = vmatpush1.bf16.msra.mxu1 %v4617_v13 }
 0x45c   :  { %2565 = vmatprep.subr.bf16.mxu1 %v4622_v14  ;;  %v4662_v14 = vld [vmem:[#allocation15] ss:$8 sps:$4 sm:$0xff]  }
 0x45d   :  { %2327 = vmatpush1.bf16.msra.mxu0 %v4611_v8 }
 0x45f   :  { %2566 = vmatpush1.bf16.msra.mxu1 %v4620_v15 }
 0x460   :  { %2567 = vmatprep.subr.bf16.mxu1 %v4625_v16  ;;  %v4667_v16 = vld [vmem:[#allocation15 + $0x14] ss:$8 sps:$4 sm:$0xff]  }
 0x463   :  { %2568 = vmatpush1.bf16.msra.mxu1 %v4623_v17  ;;  %v4665_v17 = vld [vmem:[#allocation15 + $0x10] ss:$8 sps:$4 sm:$0xff]  }
 0x464   :  { %2569 = vmatprep.subr.bf16.mxu1 %v4628_v18  ;;  %v4670_v18 = vld [vmem:[#allocation15 + $0x24] ss:$8 sps:$4 sm:$0xff]  }
 0x467   :  { %2570 = vmatpush1.bf16.msra.mxu1 %v4626_v19  ;;  %v4668_v19 = vld [vmem:[#allocation15 + $0x20] ss:$8 sps:$4 sm:$0xff]  }
 0x468   :  { %2571 = vmatprep.subr.bf16.mxu1 %v4631_v20  ;;  %v4673_v20 = vld [vmem:[#allocation15 + $0x34] ss:$8 sps:$4 sm:$0xff]  }
 0x46b   :  { %2572 = vmatpush1.bf16.msra.mxu1 %v4629_v21  ;;  %v4671_v21 = vld [vmem:[#allocation15 + $0x30] ss:$8 sps:$4 sm:$0xff]  }
 0x46c   :  { %2573 = vmatprep.subr.bf16.mxu1 %v4634_v22  ;;  %v4676_v22 = vld [vmem:[#allocation15 + $0x44] ss:$8 sps:$4 sm:$0xff]  }
 0x46f   :  { %2574 = vmatpush1.bf16.msra.mxu1 %v4632_v23  ;;  %v4674_v23 = vld [vmem:[#allocation15 + $0x40] ss:$8 sps:$4 sm:$0xff]  }
 0x470   :  { %2575 = vmatprep.subr.bf16.mxu1 %v4637_v24  ;;  %v4679_v24 = vld [vmem:[#allocation15 + $0x54] ss:$8 sps:$4 sm:$0xff]  }
 0x473   :  { %2576 = vmatpush1.bf16.msra.mxu1 %v4635_v25  ;;  %v4677_v25 = vld [vmem:[#allocation15 + $0x50] ss:$8 sps:$4 sm:$0xff]  }
 0x474   :  { %2577 = vmatprep.subr.bf16.mxu1 %v4640_v26  ;;  %v4682_v26 = vld [vmem:[#allocation15 + $0x64] ss:$8 sps:$4 sm:$0xff]  }
 0x477   :  { %2578 = vmatpush1.bf16.msra.mxu1 %v4638_v27  ;;  %v4680_v27 = vld [vmem:[#allocation15 + $0x60] ss:$8 sps:$4 sm:$0xff]  }
 0x478   :  { %2579 = vmatprep.subr.bf16.mxu1 %v4643_v28  ;;  %v4685_v28 = vld [vmem:[#allocation15 + $0x74] ss:$8 sps:$4 sm:$0xff]  }
 0x47b   :  { %2580 = vmatpush1.bf16.msra.mxu1 %v4641_v29  ;;  %v4683_v29 = vld [vmem:[#allocation15 + $0x70] ss:$8 sps:$4 sm:$0xff]  }
 0x47c   :  { %2581 = vmatprep.subr.bf16.mxu1 %v4646_v30  ;;  %v4688_v30 = vld [vmem:[#allocation15 + $0x84] ss:$8 sps:$4 sm:$0xff]  }
 0x47f   :  { %2582 = vmatpush1.bf16.msra.mxu1 %v4644_v31  ;;  %v4686_v31 = vld [vmem:[#allocation15 + $0x80] ss:$8 sps:$4 sm:$0xff]  }
 0x480   :  { %2583 = vmatprep.subr.bf16.mxu1 %v4649_v32  ;;  %v4691_v32 = vld [vmem:[#allocation15 + $0x94] ss:$8 sps:$4 sm:$0xff]  }
 0x483   :  { %2584 = vmatpush1.bf16.msra.mxu1 %v4647_v33  ;;  %v4689_v33 = vld [vmem:[#allocation15 + $0x90] ss:$8 sps:$4 sm:$0xff]  }
 0x484   :  { %2585 = vmatprep.subr.bf16.mxu1 %v4652_v34  ;;  %v4694_v34 = vld [vmem:[#allocation15 + $0xa4] ss:$8 sps:$4 sm:$0xff]  }
 0x487   :  { %2586 = vmatpush1.bf16.msra.mxu1 %v4650_v35  ;;  %v4692_v35 = vld [vmem:[#allocation15 + $0xa0] ss:$8 sps:$4 sm:$0xff]  }
 0x488   :  { %2587 = vmatprep.subr.bf16.mxu1 %v4655_v36  ;;  %v4697_v36 = vld [vmem:[#allocation15 + $0xb4] ss:$8 sps:$4 sm:$0xff]  }
 0x48b   :  { %2588 = vmatpush1.bf16.msra.mxu1 %v4653_v37  ;;  %v4695_v37 = vld [vmem:[#allocation15 + $0xb0] ss:$8 sps:$4 sm:$0xff]  }
 0x48c   :  { %2589 = vmatprep.subr.bf16.mxu1 %v4658_v61  ;;  %v4734_v61 = vld [vmem:[#allocation18 + $0xc0] ss:$24 sps:$4 sm:$0xff]  }
 0x48f   :  { %2590 = vmatpush1.bf16.msra.mxu1 %v4656_v62  ;;  %v4742_v62 = vld [vmem:[#allocation18 + $0xf4] ss:$24 sps:$4 sm:$0xff]  }
 0x490   :  { %2591 = vmatprep.subr.bf16.mxu1 %v4661_v63  ;;  %v4740_v63 = vld [vmem:[#allocation18 + $0xf0] ss:$24 sps:$4 sm:$0xff]  }
 0x493   :  { %2592 = vmatpush1.bf16.msra.mxu1 %v4659_v0  ;;  %v4748_v0 = vld [vmem:[#allocation18 + $0x124] ss:$24 sps:$4 sm:$0xff]  }
 0x494   :  { %2856 = vmatprep.subr.bf16.mxu1 %v4664_v1  ;;  %v4746_v1 = vld [vmem:[#allocation18 + $0x120] ss:$24 sps:$4 sm:$0xff]  }
 0x509   :  { %v1714_v41 = vpop.f32.mrb[8].mxu1 }
 0x50a   :  { %v5880_v42 = vadd.f32 %v1714_v41, %v1513_v39  ;;  %v1716_v43 = vpop.f32.mrb[9].mxu1  ;;  %v4698_v39 = vld [vmem:[#allocation15 + $0xc0] ss:$8 sps:$4 sm:$0xff]   ;;  %v4701_v41 = vld [vmem:[#allocation15 + $0xd0] ss:$8 sps:$4 sm:$0xff]  }
 0x50b   :  { %v5882_v44 = vadd.f32 %v1716_v43, %v1517_v40  ;;  %v1718_v45 = vpop.f32.mrb[10].mxu1  ;;  %v4703_v40 = vld [vmem:[#allocation15 + $0xd4] ss:$8 sps:$4 sm:$0xff]   ;;  %v4706_v43 = vld [vmem:[#allocation15 + $0xe4] ss:$8 sps:$4 sm:$0xff]  }
 0x50c   :  { %v1719_v48 = vpop.f32.mrb[11].mxu1  ;;  %v4704_v45 = vld [vmem:[#allocation15 + $0xe0] ss:$8 sps:$4 sm:$0xff]  }
 0x50d   :  { %v1723_v50 = vcombine.low %v5880_v42, %v5882_v44  ;;  %v4709_v48 = vld [vmem:[#allocation15 + $0xf4] ss:$8 sps:$4 sm:$0xff]  }
 0x50f   :  { %3903 = vst.sshfl [vmem:[%s5962_s23] sm:$0x33 pattern:$0x76325410] %v1723_v50  ;;  %v4707_v50 = vld [vmem:[#allocation15 + $0xf0] ss:$8 sps:$4 sm:$0xff]  }
 0x529   :  { %v1952_v52 = vpop.f32.mrb[12].mxu1 }
 0x52a   :  { %v1953_v53 = vadd.f32 %v3913_v51, %v1952_v52  ;;  %v4188_v54 = vpop.f32.mrb[13].mxu1  ;;  %v4710_v51 = vld [vmem:[#allocation18] ss:$24 sps:$4 sm:$0xff]   ;;  %v4712_v52 = vld [vmem:[#allocation18 + $0x4] ss:$24 sps:$4 sm:$0xff]  }
 0x52b   :  { %v1955_v55 = vpop.f32.mrb[14].mxu1  ;;  %v4718_v54 = vld [vmem:[#allocation18 + $0x34] ss:$24 sps:$4 sm:$0xff]   ;;  %3519 = vmatprep.subr.bf16.mxu0 %v4712_v52 }
 0x52c   :  { %v1961_v56 = vrot.slane %v1953_v53, %v5842_v47  ;;  %v1965_v57 = vrot.slane %v1953_v53, %v5848_v49  ;;  %v4189_v58 = vpop.f32.mrb[15].mxu1  ;;  %v4715_v53 = vld [vmem:[#allocation18 + $0xc] ss:$24 sps:$4 sm:$0xff]   ;;  %v4716_v55 = vld [vmem:[#allocation18 + $0x30] ss:$24 sps:$4 sm:$0xff]  }
 0x52d   :  { %v4730_v58 = vld [vmem:[#allocation18 + $0x94] ss:$24 sps:$4 sm:$0xff]  }
 0x52e   :  { %v1967_v59 = vsel %vm1966_vm1, %v1961_v56, %v1965_v57  ;;  %v4724_v56 = vld [vmem:[#allocation18 + $0x64] ss:$24 sps:$4 sm:$0xff]   ;;  %v4722_v57 = vld [vmem:[#allocation18 + $0x60] ss:$24 sps:$4 sm:$0xff]  }
 0x52f   :  { %v1970_v60 = vpack.c.bf16 %v1967_v59, %v1967_v59  ;;  %v4728_v59 = vld [vmem:[#allocation18 + $0x90] ss:$24 sps:$4 sm:$0xff]  }
 0x531   :  { %2345 = vmatmul.mubr.bf16.vlgmr.msra.gmra.mrb[8].mxu0 %v1970_v60  ;;  %v4736_v60 = vld [vmem:[#allocation18 + $0xc4] ss:$24 sps:$4 sm:$0xff]  }
 0x532   :  { %3520 = vmatpush1.bf16.msra.mxu0 %v4710_v51 }
 0x533   :  { %3521 = vmatprep.subr.bf16.mxu0 %v4718_v54 }
 0x536   :  { %3522 = vmatpush1.bf16.msra.mxu0 %v4716_v55 }
 0x537   :  { %3523 = vmatprep.subr.bf16.mxu0 %v4724_v56 }
 0x53a   :  { %3524 = vmatpush1.bf16.msra.mxu0 %v4722_v57 }
 0x53b   :  { %3525 = vmatprep.subr.bf16.mxu0 %v4730_v58 }
 0x53e   :  { %3526 = vmatpush1.bf16.msra.mxu0 %v4728_v59 }
 0x53f   :  { %3527 = vmatprep.subr.bf16.mxu0 %v4736_v60 }
 0x542   :  { %3528 = vmatpush1.bf16.msra.mxu0 %v4734_v61 }
 0x543   :  { %3529 = vmatprep.subr.bf16.mxu0 %v4742_v62 }
 0x546   :  { %3530 = vmatpush1.bf16.msra.mxu0 %v4740_v63 }
 0x547   :  { %3531 = vmatprep.subr.bf16.mxu0 %v4748_v0 }
 0x54a   :  { %3532 = vmatpush1.bf16.msra.mxu0 %v4746_v1 }
 0x54b   :  { %3533 = vmatprep.subr.bf16.mxu0 %v4754_v7 }
 0x604   :  { %v2346_v4 = vpop.f32.mrb[8].mxu0 }
 0x605   :  { %v4194_v5 = vadd.f32 %v2346_v4, %v2024_v2  ;;  %v2348_v6 = vpop.f32.mrb[9].mxu0  ;;  %v4752_v2 = vld [vmem:[#allocation18 + $0x150] ss:$24 sps:$4 sm:$0xff]   ;;  %v4758_v4 = vld [vmem:[#allocation18 + $0x180] ss:$24 sps:$4 sm:$0xff]  }
 0x606   :  { %v4195_v8 = vadd.f32 %v2348_v6, %v2028_v3  ;;  %v2350_v9 = vpop.f32.mrb[10].mxu0  ;;  %v4760_v3 = vld [vmem:[#allocation18 + $0x184] ss:$24 sps:$4 sm:$0xff]   ;;  %3534 = vmatpush1.bf16.msra.mxu0 %v4752_v2  ;;  %v4764_v6 = vld [vmem:[#allocation18 + $0x1b0] ss:$24 sps:$4 sm:$0xff]  }
 0x607   :  { %v2353_v10 = vmax.f32 %v4194_v5, 0.0  ;;  %v2351_v11 = vpop.f32.mrb[11].mxu0  ;;  %3535 = vmatprep.subr.bf16.mxu0 %v4760_v3  ;;  %v4766_v5 = vld [vmem:[#allocation18 + $0x1b4] ss:$24 sps:$4 sm:$0xff]   ;;  %v4770_v9 = vld [vmem:[#allocation18 + $0x1e0] ss:$24 sps:$4 sm:$0xff]  }
 0x608   :  { %v2354_v12 = vmax.f32 %v4195_v8, 0.0  ;;  %v4772_v8 = vld [vmem:[#allocation18 + $0x1e4] ss:$24 sps:$4 sm:$0xff]   ;;  %v4776_v11 = vld [vmem:[#allocation18 + $0x210] ss:$24 sps:$4 sm:$0xff]  }
 0x609   :  { %v2355_v15 = vpack.c.bf16 %v2353_v10, %v2353_v10  ;;  %v4778_v10 = vld [vmem:[#allocation18 + $0x214] ss:$24 sps:$4 sm:$0xff]  }
 0x60a   :  { %v2356_v13 = vpack.c.bf16 %v2354_v12, %v2354_v12  ;;  %3536 = vmatpush1.bf16.msra.mxu0 %v4758_v4  ;;  %v4784_v12 = vld [vmem:[#allocation18 + $0x244] ss:$24 sps:$4 sm:$0xff]  }
 0x60b   :  { %3537 = vmatprep.subr.bf16.mxu0 %v4766_v5 }
 0x60c   :  { %2593 = vmatprep.mubr.bf16.mxu1 %v2356_v13  ;;  %v4782_v13 = vld [vmem:[#allocation18 + $0x240] ss:$24 sps:$4 sm:$0xff]  }
 0x60d   :  { %2594 = vmatmul.mubr.bf16.vlgmr.msra.gmra.mrb[16].mxu1 %v2355_v15  ;;  %v4788_v15 = vld [vmem:[#allocation18 + $0x270] ss:$24 sps:$4 sm:$0xff]  }
 0x60e   :  { %2857 = vmatpush1.bf16.msra.mxu1 %v4662_v14  ;;  %3538 = vmatpush1.bf16.msra.mxu0 %v4764_v6  ;;  %v4790_v14 = vld [vmem:[#allocation18 + $0x274] ss:$24 sps:$4 sm:$0xff]  }
 0x60f   :  { %2858 = vmatprep.subr.bf16.mxu1 %v4667_v16  ;;  %3539 = vmatprep.subr.bf16.mxu0 %v4772_v8  ;;  %v4796_v16 = vld [vmem:[#allocation18 + $0x2a4] ss:$24 sps:$4 sm:$0xff]  }
 0x612   :  { %2859 = vmatpush1.bf16.msra.mxu1 %v4665_v17  ;;  %3540 = vmatpush1.bf16.msra.mxu0 %v4770_v9  ;;  %v4794_v17 = vld [vmem:[#allocation18 + $0x2a0] ss:$24 sps:$4 sm:$0xff]  }
 0x613   :  { %2860 = vmatprep.subr.bf16.mxu1 %v4670_v18  ;;  %3541 = vmatprep.subr.bf16.mxu0 %v4778_v10  ;;  %v2389_v18 = vld [vmem:[#allocation13] sm:$0x3]  ;;  %v4713_v9 = vld [vmem:[#allocation18 + $0x8] ss:$24 sps:$4 sm:$0xff]  }
 0x616   :  { %2861 = vmatpush1.bf16.msra.mxu1 %v4668_v19  ;;  %3542 = vmatpush1.bf16.msra.mxu0 %v4776_v11  ;;  %v2394_v19 = vrot.slane %v2389_v18, %v5842_v47  ;;  %v4721_v11 = vld [vmem:[#allocation18 + $0x3c] ss:$24 sps:$4 sm:$0xff]  }
 0x617   :  { %2862 = vmatprep.subr.bf16.mxu1 %v4673_v20  ;;  %3543 = vmatprep.subr.bf16.mxu0 %v4784_v12  ;;  %v2398_v20 = vrot.slane %v2389_v18, %v5848_v49  ;;  %v4719_v12 = vld [vmem:[#allocation18 + $0x38] ss:$24 sps:$4 sm:$0xff]  }
 0x618   :  { %v4743_v18 = vld [vmem:[#allocation18 + $0xf8] ss:$24 sps:$4 sm:$0xff]  }
 0x61a   :  { %2863 = vmatpush1.bf16.msra.mxu1 %v4671_v21  ;;  %3544 = vmatpush1.bf16.msra.mxu0 %v4782_v13  ;;  %v4727_v13 = vld [vmem:[#allocation18 + $0x6c] ss:$24 sps:$4 sm:$0xff]  }
 0x61b   :  { %2864 = vmatprep.subr.bf16.mxu1 %v4676_v22  ;;  %3545 = vmatprep.subr.bf16.mxu0 %v4790_v14  ;;  %v4725_v14 = vld [vmem:[#allocation18 + $0x68] ss:$24 sps:$4 sm:$0xff]  }
 0x61e   :  { %2865 = vmatpush1.bf16.msra.mxu1 %v4674_v23  ;;  %3546 = vmatpush1.bf16.msra.mxu0 %v4788_v15  ;;  %v4731_v15 = vld [vmem:[#allocation18 + $0x98] ss:$24 sps:$4 sm:$0xff]  }
 0x61f   :  { %2866 = vmatprep.subr.bf16.mxu1 %v4679_v24  ;;  %3547 = vmatprep.subr.bf16.mxu0 %v4796_v16  ;;  %v4737_v16 = vld [vmem:[#allocation18 + $0xc8] ss:$24 sps:$4 sm:$0xff]  }
 0x622   :  { %2867 = vmatpush1.bf16.msra.mxu1 %v4677_v25  ;;  %3548 = vmatpush1.bf16.msra.mxu0 %v4794_v17  ;;  %v4745_v17 = vld [vmem:[#allocation18 + $0xfc] ss:$24 sps:$4 sm:$0xff]  }
 0x623   :  { %2868 = vmatprep.subr.bf16.mxu1 %v4682_v26 }
 0x626   :  { %2869 = vmatpush1.bf16.msra.mxu1 %v4680_v27 }
 0x627   :  { %2870 = vmatprep.subr.bf16.mxu1 %v4685_v28 }
 0x62a   :  { %2871 = vmatpush1.bf16.msra.mxu1 %v4683_v29 }
 0x62b   :  { %2872 = vmatprep.subr.bf16.mxu1 %v4688_v30 }
 0x62e   :  { %2873 = vmatpush1.bf16.msra.mxu1 %v4686_v31 }
 0x62f   :  { %2874 = vmatprep.subr.bf16.mxu1 %v4691_v32 }
 0x632   :  { %2875 = vmatpush1.bf16.msra.mxu1 %v4689_v33 }
 0x633   :  { %2876 = vmatprep.subr.bf16.mxu1 %v4694_v34 }
 0x636   :  { %2877 = vmatpush1.bf16.msra.mxu1 %v4692_v35 }
 0x637   :  { %2878 = vmatprep.subr.bf16.mxu1 %v4697_v36 }
 0x63a   :  { %2879 = vmatpush1.bf16.msra.mxu1 %v4695_v37 }
 0x63b   :  { %2880 = vmatprep.subr.bf16.mxu1 %v4700_v38 }
 0x63e   :  { %2881 = vmatpush1.bf16.msra.mxu1 %v4698_v39 }
 0x63f   :  { %2882 = vmatprep.subr.bf16.mxu1 %v4703_v40 }
 0x642   :  { %2883 = vmatpush1.bf16.msra.mxu1 %v4701_v41 }
 0x643   :  { %2884 = vmatprep.subr.bf16.mxu1 %v4706_v43 }
 0x646   :  { %2885 = vmatpush1.bf16.msra.mxu1 %v4704_v45 }
 0x647   :  { %2886 = vmatprep.subr.bf16.mxu1 %v4709_v48 }
 0x64a   :  { %2887 = vmatpush1.bf16.msra.mxu1 %v4707_v50 }
 0x64b   :  { %3560 = vmatprep.subr.bf16.mxu1 %v4715_v53 }
 0x6e0   :  { %v2595_v21 = vpop.f32.mrb[16].mxu1 }
 0x6e1   :  { %v2596_v22 = vadd.f32 %v2595_v21, %v2394_v19  ;;  %v2597_v23 = vpop.f32.mrb[17].mxu1  ;;  %v4751_v19 = vld [vmem:[#allocation18 + $0x12c] ss:$24 sps:$4 sm:$0xff]   ;;  %v4757_v21 = vld [vmem:[#allocation18 + $0x15c] ss:$24 sps:$4 sm:$0xff]  }
 0x6e2   :  { %v2598_v24 = vadd.f32 %v2597_v23, %v2398_v20  ;;  %v2599_v25 = vpop.f32.mrb[18].mxu1  ;;  %v4749_v20 = vld [vmem:[#allocation18 + $0x128] ss:$24 sps:$4 sm:$0xff]   ;;  %v4763_v23 = vld [vmem:[#allocation18 + $0x18c] ss:$24 sps:$4 sm:$0xff]  }
 0x6e3   :  { %2602 = vst [vmem:[%s5963_s24] sm:$0xff] %v2596_v22  ;;  %v2604_v26 = vsel %vm1966_vm1, %v2596_v22, 0.0  ;;  %v2625_v27 = vrot.slane %v2596_v22, 4  ;;  %v2600_v28 = vpop.f32.mrb[19].mxu1  ;;  %v4755_v22 = vld [vmem:[#allocation18 + $0x158] ss:$24 sps:$4 sm:$0xff]  }
 0x6e4   :  { %v2605_v29 = vrot.slane %v2604_v26, 4  ;;  %2603 = vst [vmem:[%s5963_s24 + $0x8] sm:$0xff] %v2598_v24  ;;  %v2611_v30 = vsel %vm1966_vm1, %v2598_v24, 0.0  ;;  %v2626_v31 = vrot.slane %v2598_v24, 4  ;;  %v4761_v24 = vld [vmem:[#allocation18 + $0x188] ss:$24 sps:$4 sm:$0xff]  }
 0x6e5   :  { %v2629_v32 = vsel %vm1966_vm1, %v2625_v27, 0.0  ;;  %v2612_v33 = vrot.slane %v2611_v30, 4  ;;  %v4769_v25 = vld [vmem:[#allocation18 + $0x1bc] ss:$24 sps:$4 sm:$0xff]   ;;  %v4775_v27 = vld [vmem:[#allocation18 + $0x1ec] ss:$24 sps:$4 sm:$0xff]  }
 0x6e6   :  { %v2606_v34 = vadd.f32 %v2605_v29, %v2604_v26  ;;  %v2630_v35 = vrot.slane %v2629_v32, 4  ;;  %v2636_v36 = vsel %vm1966_vm1, %v2626_v31, 0.0  ;;  %v4767_v26 = vld [vmem:[#allocation18 + $0x1b8] ss:$24 sps:$4 sm:$0xff]   ;;  %v4773_v28 = vld [vmem:[#allocation18 + $0x1e8] ss:$24 sps:$4 sm:$0xff]  }
 0x6e7   :  { %v2613_v37 = vadd.f32 %v2612_v33, %v2611_v30  ;;  %v2637_v38 = vrot.slane %v2636_v36, 4  ;;  %v4781_v29 = vld [vmem:[#allocation18 + $0x21c] ss:$24 sps:$4 sm:$0xff]   ;;  %v4779_v30 = vld [vmem:[#allocation18 + $0x218] ss:$24 sps:$4 sm:$0xff]  }
 0x6e8   :  { %v2607_v39 = vrot.slane %v2606_v34, 2  ;;  %v2631_v40 = vadd.f32 %v2630_v35, %v2629_v32  ;;  %v4787_v31 = vld [vmem:[#allocation18 + $0x24c] ss:$24 sps:$4 sm:$0xff]   ;;  %v4785_v32 = vld [vmem:[#allocation18 + $0x248] ss:$24 sps:$4 sm:$0xff]  }
 0x6e9   :  { %v2614_v41 = vrot.slane %v2613_v37, 2  ;;  %v2638_v43 = vadd.f32 %v2637_v38, %v2636_v36  ;;  %v4793_v33 = vld [vmem:[#allocation18 + $0x27c] ss:$24 sps:$4 sm:$0xff]   ;;  %v4799_v35 = vld [vmem:[#allocation18 + $0x2ac] ss:$24 sps:$4 sm:$0xff]  }
 0x6ea   :  { %v2608_v45 = vadd.f32 %v2607_v39, %v2606_v34  ;;  %v2632_v48 = vrot.slane %v2631_v40, 2  ;;  %v4791_v34 = vld [vmem:[#allocation18 + $0x278] ss:$24 sps:$4 sm:$0xff]   ;;  %v4797_v36 = vld [vmem:[#allocation18 + $0x2a8] ss:$24 sps:$4 sm:$0xff]  }
 0x6eb   :  { %v2615_v50 = vadd.f32 %v2614_v41, %v2613_v37  ;;  %v2639_v51 = vrot.slane %v2638_v43, 2  ;;  %v4802_v37 = vld [vmem:[#allocation18 + $0x2d4] ss:$24 sps:$4 sm:$0xff]   ;;  %v4800_v38 = vld [vmem:[#allocation18 + $0x2d0] ss:$24 sps:$4 sm:$0xff]  }
 0x6ec   :  { %v2609_v52 = vrot.slane %v2608_v45, 1  ;;  %v2633_v53 = vadd.f32 %v2632_v48, %v2631_v40  ;;  %v4805_v39 = vld [vmem:[#allocation18 + $0x2dc] ss:$24 sps:$4 sm:$0xff]   ;;  %3549 = vmatprep.subr.bf16.mxu0 %v4802_v37  ;;  %v4803_v40 = vld [vmem:[#allocation18 + $0x2d8] ss:$24 sps:$4 sm:$0xff]  }
 0x6ed   :  { %v2616_v54 = vrot.slane %v2615_v50, 1  ;;  %v2640_v55 = vadd.f32 %v2639_v51, %v2638_v43  ;;  %3550 = vmatpush1.bf16.msra.mxu0 %v4800_v38  ;;  %v4808_v41 = vld [vmem:[#allocation18 + $0x14] ss:$24 sps:$4 sm:$0xff]   ;;  %v2684_v43 = vld [vmem:[#allocation16] sm:$0x3] }
 0x6ee   :  { %v2610_v56 = vadd.f32 %v2609_v52, %v2608_v45  ;;  %v2634_v57 = vrot.slane %v2633_v53, 1  ;;  %3601 = vmatprep.subr.bf16.mxu0 %v4808_v41  ;;  %v2689_v45 = vrot.slane %v2684_v43, %v5842_v47  ;;  %v2693_v48 = vrot.slane %v2684_v43, %v5848_v49 }
 0x6ef   :  { %v2617_v58 = vadd.f32 %v2616_v54, %v2615_v50  ;;  %v2641_v59 = vrot.slane %v2640_v55, 1 }
 0x6f0   :  { %v2619_v60 = vmul.f32 0.25, %v2610_v56  ;;  %v2635_v61 = vadd.f32 %v2634_v57, %v2633_v53 }
 0x6f1   :  { %v2620_v62 = vmul.f32 0.25, %v2617_v58  ;;  %v2642_v63 = vadd.f32 %v2641_v59, %v2640_v55  ;;  %v4806_v58 = vld [vmem:[#allocation18 + $0x10] ss:$24 sps:$4 sm:$0xff]  }
 0x6f2   :  { %v2643_v0 = vmul.f32 0.25, %v2635_v61  ;;  %v2621_v7 = vadd.f32 %v2619_v60, %v5880_v42  ;;  %v4811_v60 = vld [vmem:[#allocation18 + $0x44] ss:$24 sps:$4 sm:$0xff]   ;;  %v4809_v61 = vld [vmem:[#allocation18 + $0x40] ss:$24 sps:$4 sm:$0xff]  }
 0x6f3   :  { %v2644_v1 = vmul.f32 0.25, %v2642_v63  ;;  %v2622_v3 = vadd.f32 %v2620_v62, %v5882_v44  ;;  %v4814_v62 = vld [vmem:[#allocation18 + $0x74] ss:$24 sps:$4 sm:$0xff]   ;;  %v4812_v63 = vld [vmem:[#allocation18 + $0x70] ss:$24 sps:$4 sm:$0xff]  }
 0x6f4   :  { %v2645_v2 = vadd.f32 %v2643_v0, %v5880_v42  ;;  %v4733_v42 = vld [vmem:[#allocation18 + $0x9c] ss:$24 sps:$4 sm:$0xff]  }
 0x6f5   :  { %v2646_v4 = vadd.f32 %v2644_v1, %v5882_v44  ;;  %v4739_v44 = vld [vmem:[#allocation18 + $0xcc] ss:$24 sps:$4 sm:$0xff]   ;;  %v4815_v1 = vld [vmem:[#allocation18 + $0xa0] ss:$24 sps:$4 sm:$0xff]  }
 0x6f6   :  { %v2648_v5 = vsel %vm2647_vm2, %v2621_v7, %v2645_v2  ;;  %v4817_v0 = vld [vmem:[#allocation18 + $0xa4] ss:$24 sps:$4 sm:$0xff]   ;;  %v4820_v7 = vld [vmem:[#allocation18 + $0xd4] ss:$24 sps:$4 sm:$0xff]   ;;  %v4818_v2 = vld [vmem:[#allocation18 + $0xd0] ss:$24 sps:$4 sm:$0xff]  }
 0x6f7   :  { %v2649_v6 = vsel %vm2647_vm2, %v2622_v3, %v2646_v4  ;;  %v2650_v10 = vpack.c.bf16 %v2648_v5, %v2648_v5  ;;  %v4823_v3 = vld [vmem:[#allocation18 + $0x104] ss:$24 sps:$4 sm:$0xff]   ;;  %v4821_v4 = vld [vmem:[#allocation18 + $0x100] ss:$24 sps:$4 sm:$0xff]   ;;  %v4826_v5 = vld [vmem:[#allocation18 + $0x134] ss:$24 sps:$4 sm:$0xff]  }
 0x6f8   :  { %v2651_v8 = vpack.c.bf16 %v2649_v6, %v2649_v6  ;;  %v4824_v6 = vld [vmem:[#allocation18 + $0x130] ss:$24 sps:$4 sm:$0xff]  }
 0x6fa   :  { %2888 = vmatprep.mubr.bf16.mxu1 %v2651_v8  ;;  %v4829_v8 = vld [vmem:[#allocation18 + $0x164] ss:$24 sps:$4 sm:$0xff]  }
 0x6fb   :  { %2889 = vmatmul.mubr.bf16.vlgmr.msra.gmra.mrb[20].mxu1 %v2650_v10  ;;  %v4832_v10 = vld [vmem:[#allocation18 + $0x194] ss:$24 sps:$4 sm:$0xff]  }
 0x6fc   :  { %3561 = vmatpush1.bf16.msra.mxu1 %v4713_v9  ;;  %v4827_v9 = vld [vmem:[#allocation18 + $0x160] ss:$24 sps:$4 sm:$0xff]  }
 0x6fd   :  { %3562 = vmatprep.subr.bf16.mxu1 %v4721_v11  ;;  %v4830_v11 = vld [vmem:[#allocation18 + $0x190] ss:$24 sps:$4 sm:$0xff]  }
 0x700   :  { %3563 = vmatpush1.bf16.msra.mxu1 %v4719_v12  ;;  %v4835_v12 = vld [vmem:[#allocation18 + $0x1c4] ss:$24 sps:$4 sm:$0xff]  }
 0x701   :  { %3564 = vmatprep.subr.bf16.mxu1 %v4727_v13  ;;  %v4833_v13 = vld [vmem:[#allocation18 + $0x1c0] ss:$24 sps:$4 sm:$0xff]  }
 0x704   :  { %3565 = vmatpush1.bf16.msra.mxu1 %v4725_v14  ;;  %v4838_v14 = vld [vmem:[#allocation18 + $0x1f4] ss:$24 sps:$4 sm:$0xff]  }
 0x705   :  { %3566 = vmatprep.subr.bf16.mxu1 %v4733_v42  ;;  %v4836_v42 = vld [vmem:[#allocation18 + $0x1f0] ss:$24 sps:$4 sm:$0xff]  }
 0x708   :  { %3567 = vmatpush1.bf16.msra.mxu1 %v4731_v15  ;;  %v4841_v15 = vld [vmem:[#allocation18 + $0x224] ss:$24 sps:$4 sm:$0xff]  }
 0x709   :  { %3568 = vmatprep.subr.bf16.mxu1 %v4739_v44  ;;  %v4839_v44 = vld [vmem:[#allocation18 + $0x220] ss:$24 sps:$4 sm:$0xff]  }
 0x70c   :  { %3569 = vmatpush1.bf16.msra.mxu1 %v4737_v16  ;;  %v4844_v16 = vld [vmem:[#allocation18 + $0x254] ss:$24 sps:$4 sm:$0xff]  }
 0x70d   :  { %3570 = vmatprep.subr.bf16.mxu1 %v4745_v17  ;;  %v4842_v17 = vld [vmem:[#allocation18 + $0x250] ss:$24 sps:$4 sm:$0xff]  }
 0x710   :  { %3571 = vmatpush1.bf16.msra.mxu1 %v4743_v18  ;;  %v4847_v18 = vld [vmem:[#allocation18 + $0x284] ss:$24 sps:$4 sm:$0xff]  }
 0x711   :  { %3572 = vmatprep.subr.bf16.mxu1 %v4751_v19  ;;  %v4845_v19 = vld [vmem:[#allocation18 + $0x280] ss:$24 sps:$4 sm:$0xff]  }
 0x714   :  { %3573 = vmatpush1.bf16.msra.mxu1 %v4749_v20  ;;  %v4850_v20 = vld [vmem:[#allocation18 + $0x2b4] ss:$24 sps:$4 sm:$0xff]  }
 0x715   :  { %3574 = vmatprep.subr.bf16.mxu1 %v4757_v21  ;;  %v4848_v21 = vld [vmem:[#allocation18 + $0x2b0] ss:$24 sps:$4 sm:$0xff]  }
 0x718   :  { %3575 = vmatpush1.bf16.msra.mxu1 %v4755_v22  ;;  %v4853_v22 = vld [vmem:[#allocation18 + $0x2e4] ss:$24 sps:$4 sm:$0xff]  }
 0x719   :  { %3576 = vmatprep.subr.bf16.mxu1 %v4763_v23  ;;  %v4851_v23 = vld [vmem:[#allocation18 + $0x2e0] ss:$24 sps:$4 sm:$0xff]  }
 0x71c   :  { %3577 = vmatpush1.bf16.msra.mxu1 %v4761_v24  ;;  %v3019_v24 = vsub.s32 2, %v5839_v46 }
 0x71d   :  { %3578 = vmatprep.subr.bf16.mxu1 %v4769_v25  ;;  %v3007_v25 = vld [vmem:[%s5993_s12] sm:$0x3f] }
 0x720   :  { %3579 = vmatpush1.bf16.msra.mxu1 %v4767_v26  ;;  %v3023_v26 = vsub.s32 3, %v5839_v46 }
 0x721   :  { %3580 = vmatprep.subr.bf16.mxu1 %v4775_v27  ;;  %v3012_v27 = vrot.slane %v3007_v25, %v5842_v47  ;;  %v5140_v47 = vmov 1983009808  }
 0x724   :  { %3581 = vmatpush1.bf16.msra.mxu1 %v4773_v28  ;;  %v3020_v28 = vrot.slane %v3007_v25, %v3019_v24 }
 0x725   :  { %3582 = vmatprep.subr.bf16.mxu1 %v4781_v29  ;;  %v3016_v29 = vrot.slane %v3007_v25, %v5848_v49 }
 0x728   :  { %3583 = vmatpush1.bf16.msra.mxu1 %v4779_v30  ;;  %v3024_v30 = vrot.slane %v3007_v25, %v3023_v26 }
 0x729   :  { %3584 = vmatprep.subr.bf16.mxu1 %v4787_v31 }
 0x72c   :  { %3585 = vmatpush1.bf16.msra.mxu1 %v4785_v32 }
 0x72d   :  { %3586 = vmatprep.subr.bf16.mxu1 %v4793_v33 }
 0x730   :  { %3587 = vmatpush1.bf16.msra.mxu1 %v4791_v34 }
 0x731   :  { %3588 = vmatprep.subr.bf16.mxu1 %v4799_v35 }
 0x734   :  { %3589 = vmatpush1.bf16.msra.mxu1 %v4797_v36 }
 0x735   :  { %3590 = vmatprep.subr.bf16.mxu1 %v4805_v39 }
 0x738   :  { %3591 = vmatpush1.bf16.msra.mxu1 %v4803_v40 }
 0x7ce   :  { %v2890_v50 = vpop.f32.mrb[20].mxu1 }
 0x7cf   :  { %v2891_v51 = vadd.f32 %v2890_v50, %v2689_v45  ;;  %v2892_v52 = vpop.f32.mrb[21].mxu1  ;;  %v3657_v45 = vunpack.c.l.s4 %v5140_v47 }
 0x7d0   :  { %v2893_v53 = vadd.f32 %v2892_v52, %v2693_v48  ;;  %v2894_v54 = vpop.f32.mrb[22].mxu1 }
 0x7d1   :  { %v2895_v55 = vpop.f32.mrb[23].mxu1  ;;  %v5915_v59 = vpack.c.bf16 %v2891_v51, %v2891_v51  ;;  %v3658_v49 = vunpack.c.0.s8 %v3657_v45 }
 0x7d2   :  { %v2899_v56 = vcombine.low %v2891_v51, %v2893_v53  ;;  %v2910_v57 = vpack.c.bf16 %v2893_v53, %v2893_v53 }
 0x7d3   :  { %v3661_v51 = vsub.s32 %v3658_v49, %v5839_v46 }
 0x7d4   :  { %4034 = vst.sshfl [vmem:[%s5964_s25] sm:$0x33 pattern:$0x76325410] %v2899_v56  ;;  %3551 = vmatprep.mubr.bf16.mxu0 %v2910_v57  ;;  %3592 = vmatprep.mubr.bf16.mxu1 %v2910_v57 }
 0x7d5   :  { %3552 = vmatmul.mubr.bf16.vlgmr.msra.gmra.mrb[12].mxu0 %v5915_v59  ;;  %3593 = vmatmul.mubr.bf16.vlgmr.msra.gmra.mrb[24].mxu1 %v5915_v59 }
 0x7d6   :  { %3602 = vmatpush1.bf16.msra.mxu0 %v4806_v58  ;;  %3633 = vmatprep.mubr.bf16.mxu0 %v2910_v57 }
 0x7d7   :  { %3603 = vmatprep.subr.bf16.mxu0 %v4811_v60  ;;  %v3031_v60 = vsub.s32 5, %v5839_v46 }
 0x7da   :  { %3604 = vmatpush1.bf16.msra.mxu0 %v4809_v61 }
 0x7db   :  { %3605 = vmatprep.subr.bf16.mxu0 %v4814_v62  ;;  %v3032_v62 = vrot.slane %v3007_v25, %v3031_v60 }
 0x7de   :  { %3606 = vmatpush1.bf16.msra.mxu0 %v4812_v63 }
 0x7df   :  { %3607 = vmatprep.subr.bf16.mxu0 %v4817_v0 }
 0x7e2   :  { %3608 = vmatpush1.bf16.msra.mxu0 %v4815_v1 }
 0x7e3   :  { %3609 = vmatprep.subr.bf16.mxu0 %v4820_v7 }
 0x7e6   :  { %3610 = vmatpush1.bf16.msra.mxu0 %v4818_v2 }
 0x7e7   :  { %3611 = vmatprep.subr.bf16.mxu0 %v4823_v3 }
 0x7ea   :  { %3612 = vmatpush1.bf16.msra.mxu0 %v4821_v4 }
 0x7eb   :  { %3613 = vmatprep.subr.bf16.mxu0 %v4826_v5 }
 0x7ee   :  { %3614 = vmatpush1.bf16.msra.mxu0 %v4824_v6 }
 0x7ef   :  { %3615 = vmatprep.subr.bf16.mxu0 %v4829_v8 }
 0x7f2   :  { %3616 = vmatpush1.bf16.msra.mxu0 %v4827_v9 }
 0x7f3   :  { %3617 = vmatprep.subr.bf16.mxu0 %v4832_v10 }
 0x7f6   :  { %3618 = vmatpush1.bf16.msra.mxu0 %v4830_v11 }
 0x7f7   :  { %3619 = vmatprep.subr.bf16.mxu0 %v4835_v12 }
 0x7fa   :  { %3620 = vmatpush1.bf16.msra.mxu0 %v4833_v13 }
 0x7fb   :  { %3621 = vmatprep.subr.bf16.mxu0 %v4838_v14 }
 0x7fe   :  { %3622 = vmatpush1.bf16.msra.mxu0 %v4836_v42 }
 0x7ff   :  { %3623 = vmatprep.subr.bf16.mxu0 %v4841_v15 }
 0x802   :  { %3624 = vmatpush1.bf16.msra.mxu0 %v4839_v44 }
 0x803   :  { %3625 = vmatprep.subr.bf16.mxu0 %v4844_v16 }
 0x806   :  { %3626 = vmatpush1.bf16.msra.mxu0 %v4842_v17 }
 0x807   :  { %3627 = vmatprep.subr.bf16.mxu0 %v4847_v18 }
 0x80a   :  { %3628 = vmatpush1.bf16.msra.mxu0 %v4845_v19 }
 0x80b   :  { %3629 = vmatprep.subr.bf16.mxu0 %v4850_v20 }
 0x80e   :  { %3630 = vmatpush1.bf16.msra.mxu0 %v4848_v21 }
 0x80f   :  { %3631 = vmatprep.subr.bf16.mxu0 %v4853_v22 }
 0x812   :  { %3632 = vmatpush1.bf16.msra.mxu0 %v4851_v23 }
 0x815   :  { %3634 = vmatmul.mubr.bf16.vlgmr.msra.gmra.mrb[16].mxu0 %v5915_v59  ;;  %v3027_v59 = vsub.s32 4, %v5839_v46 }
 0x817   :  { %v3028_v61 = vrot.slane %v3007_v25, %v3027_v59 }
 0x8a8   :  { %v3553_v31 = vpop.f32.mrb[12].mxu0  ;;  %v3594_v32 = vpop.f32.mrb[24].mxu1 }
 0x8a9   :  { %v3554_v33 = vadd.f32 %v3553_v31, %v3012_v27  ;;  %v3595_v34 = vadd.f32 %v3594_v32, %v3020_v28  ;;  %v3555_v35 = vpop.f32.mrb[13].mxu0  ;;  %v3596_v36 = vpop.f32.mrb[25].mxu1 }
 0x8aa   :  { %v3556_v37 = vadd.f32 %v3555_v35, %v3016_v29  ;;  %v3597_v38 = vadd.f32 %v3596_v36, %v3024_v30  ;;  %v3557_v39 = vpop.f32.mrb[14].mxu0  ;;  %v3598_v40 = vpop.f32.mrb[26].mxu1 }
 0x8ab   :  { %4854 = vtanh.f32 %v3554_v33  ;;  %v3558_v41 = vpop.f32.mrb[15].mxu0  ;;  %v3599_v43 = vpop.f32.mrb[27].mxu1 }
 0x8ac   :  { %4856 = vtanh.f32 %v3595_v34 }
 0x8ad   :  { %4858 = vtanh.f32 %v3556_v37 }
 0x8ae   :  { %4860 = vtanh.f32 %v3597_v38 }
 0x8b5   :  { %v4855_v48 = vpop.eup %4854 }
 0x8b6   :  { %v4857_v50 = vpop.eup %4856 }
 0x8b7   :  { %v4859_v52 = vpop.eup %4858 }
 0x8b8   :  { %v4861_v53 = vpop.eup %4860  ;;  %v3654_v54 = vcombine.low %v4855_v48, %v4859_v52 }
 0x8b9   :  { %v3655_v55 = vcombine.low %v4857_v50, %v4861_v53 }
 0x8ba   :  { %v3662_v56 = vrot.slane %v3654_v54, %v3661_v51 }
 0x8bb   :  { %v3669_v57 = vrot.slane %v3655_v55, %v3661_v51 }
 0x8bd   :  { %v3670_v58 = vcombine.low %v3662_v56, %v3669_v57 }
 0x8bf   :  { %3681 = vst [vmem:[%s5994_s19] sm:$0xff] %v3670_v58 }
 0x8e8   :  { %v3635_v63 = vpop.f32.mrb[16].mxu0 }
 0x8e9   :  { %v3636_v0 = vadd.f32 %v3635_v63, %v3028_v61  ;;  %v3637_v1 = vpop.f32.mrb[17].mxu0 }
 0x8ea   :  { %v3638_v7 = vadd.f32 %v3637_v1, %v3032_v62  ;;  %v3639_v2 = vpop.f32.mrb[18].mxu0 }
 0x8eb   :  { %4862 = vtanh.f32 %v3636_v0  ;;  %v3640_v3 = vpop.f32.mrb[19].mxu0 }
 0x8ec   :  { %4864 = vtanh.f32 %v3638_v7 }
 0x8f5   :  { %v4863_v4 = vpop.eup %4862 }
 0x8f6   :  { %v4865_v5 = vpop.eup %4864 }
 0x8f7   :  { %v3671_v6 = vcombine.low %v4863_v4, %v4865_v5 }
 0x8f9   :  { %4131 = vst.sshfl [vmem:[%s5994_s19 + $0x8] sm:$0x33 pattern:$0x76325410] %v3671_v6 }
 0x8fa   :  { %3699 = vsyncpa [#allocation3], 1 }
 0x8fb   :  { %3700 = vsyncpa [#allocation5], 1 }
 0x8fc   :  { %3701 = vsyncpa [#allocation8], 1 }
 0x8fd   :  { %3702 = vsyncpa [#allocation11], 1 }
 0x8fe   :  { %3703 = vsyncpa [#allocation14], 1 }
 0x8ff   :  { %3704 = vsyncpa [#allocation17], 1 }

</bundles_post_ra>
